<compile_context>
chip_gen: v5e
topology: v5e:2x2
jax: 0.10.0
libtpu: 0.0.40
codegen_flags: <defaults>
</compile_context>

<pallas_src>
import jax
import jax.numpy as jnp
from jax import lax
from jax.experimental import pallas as pl
from jax.experimental.pallas import tpu as pltpu

C_IN, C_OUT, KH, KW = 3, 192, 7, 7
PAD = 3
EPS = 1e-5
KD = KH * KW * C_IN                 # 147: im2col contraction depth
MATMUL_DTYPE = jnp.bfloat16         # MXU inputs (accumulation stays f32)
VMEM_LIMIT = 64 * 1024 * 1024


def _conv_kernel(p_ref, w_ref, b_ref, y_ref, s1_ref, s2_ref):
    """One (batch, row-tile) step: im2col patches @ reshaped weights on the MXU.

    p_ref : (1, TM, KD)     bf16 im2col patches (lane-dense K axis)
    w_ref : (KD, C_OUT)     bf16 conv weights reshaped to (ky, kx, cin) x cout
    b_ref : (1, C_OUT)      f32 bias
    y_ref : (1, TM, C_OUT)  bf16 conv output (pre-BN)
    s1/s2 : (1, 1, C_OUT)   f32 per-tile sum / sum-of-squares for BN stats
    """
    acc = jnp.dot(p_ref[0], w_ref[...], preferred_element_type=jnp.float32)
    acc = acc + b_ref[...]
    y_ref[0] = acc.astype(y_ref.dtype)
    # TODO(synk): E[x^2]-E[x]^2 can cancel for inputs with |mean| >> std; a
    # centered two-pass formulation would be safer for production data.
    s1_ref[0] = jnp.sum(acc, axis=0, keepdims=True)
    s2_ref[0] = jnp.sum(acc * acc, axis=0, keepdims=True)


def _bn_pool_kernel(y_ref, scale_ref, shift_ref, o_ref):
    """Fused BatchNorm affine + MaxPool2d(2, 2, pad=1) for one image.

    y_ref : (1, H, 2, W2, C)  bf16 conv output, columns de-interleaved by parity
    scale/shift : (1, C)      f32 folded BN affine (any sign of gamma is fine:
                              the affine is applied before border handling)
    o_ref : (1, Ho, Wo, C)    f32 pooled output, Ho = H//2 + 1, Wo = W2 + 1
    """
    y = y_ref[0].astype(jnp.float32)                     # (H, 2, W2, C)
    H, _, W2, C = y.shape
    Ho, Wo = H // 2 + 1, W2 + 1

    xn = y * scale_ref[...] + shift_ref[...]             # per-channel BN affine
    ye = xn[:, 0]                                        # even columns (H, W2, C)
    yo = xn[:, 1]                                        # odd  columns (H, W2, C)

    def pool_rows(v):
        # rows with pad=1: r[0] = v[0]; r[i] = max(v[2i-1], v[2i]); r[-1] = v[-1]
        mid = jnp.max(v[1:H - 1].reshape((H - 2) // 2, 2, W2, C), axis=1)
        return jnp.concatenate([v[0:1], mid, v[H - 1:H]], axis=0)   # (Ho, W2, C)

    re_ = pool_rows(ye)
    ro_ = pool_rows(yo)

    # columns with pad=1: out[:,0] = re[:,0]; out[:,j] = max(ro[:,j-1], re[:,j]);
    # out[:,Wo-1] = ro[:,W2-1]   (padded border columns never win / are dropped)
    o_ref[0, :, 0:1, :] = re_[:, 0:1, :]
    o_ref[0, :, 1:Wo - 1, :] = jnp.maximum(ro_[:, 0:W2 - 1, :], re_[:, 1:W2, :])
    o_ref[0, :, Wo - 1:Wo, :] = ro_[:, W2 - 1:W2, :]


def _pick_tile_h(H, W):
    """Largest row-tile that divides H, keeps TM a multiple of 16 and <= 2048."""
    for t in range(H, 0, -1):
        if H % t == 0 and t * W <= 2048 and (t * W) % 16 == 0:
            return t
    return H


def model_forward(x_nchw, params):
    w, b = params["w"], params["b"]
    gamma, beta = params["gamma"], params["beta"]
    N, cin, H, W = x_nchw.shape
    assert cin == C_IN
    assert H % 2 == 0 and W % 2 == 0 and H >= 4 and W >= 4
    W2 = W // 2

    # ---- im2col in the wrapper (input has only 3 channels: cheap) ----------
    # Patch rows are ordered (h, column-parity, w//2) so the conv output can be
    # viewed for free as (N, H, 2, W2, C) by the pooling kernel.
    x = jnp.transpose(x_nchw, (0, 2, 3, 1)).astype(MATMUL_DTYPE)      # NHWC
    x_pad = jnp.pad(x, ((0, 0), (PAD, PAD), (PAD, PAD), (0, 0)))

    def _taps(p):
        cols = [x_pad[:, ky:ky + H, kx + p:kx + p + W - 1:2, :]
                for ky in range(KH) for kx in range(KW)]
        return jnp.concatenate(cols, axis=-1)            # (N, H, W2, KD)

    patches = jnp.stack([_taps(0), _taps(1)], axis=2)    # (N, H, 2, W2, KD)
    patches = patches.reshape(N, H * W, KD)

    w2 = w.reshape(KD, C_OUT).astype(MATMUL_DTYPE)       # (ky, kx, cin) ordering
    b2 = b.reshape(1, C_OUT).astype(jnp.float32)

    tile_h = _pick_tile_h(H, W)
    tm = tile_h * W
    num_m = (H * W) // tm

    y_flat, s1, s2 = pl.pallas_call(
        _conv_kernel,
        out_shape=(
            jax.ShapeDtypeStruct((N, H * W, C_OUT), MATMUL_DTYPE),
            jax.ShapeDtypeStruct((N, num_m, C_OUT), jnp.float32),
            jax.ShapeDtypeStruct((N, num_m, C_OUT), jnp.float32),
        ),
        grid_spec=pltpu.PrefetchScalarGridSpec(
            num_scalar_prefetch=0,
            grid=(N, num_m),
            in_specs=[
                pl.BlockSpec((1, tm, KD), lambda n, m: (n, m, 0)),
                pl.BlockSpec((KD, C_OUT), lambda n, m: (0, 0)),
                pl.BlockSpec((1, C_OUT), lambda n, m: (0, 0)),
            ],
            out_specs=(
                pl.BlockSpec((1, tm, C_OUT), lambda n, m: (n, m, 0)),
                pl.BlockSpec((1, 1, C_OUT), lambda n, m: (n, m, 0)),
                pl.BlockSpec((1, 1, C_OUT), lambda n, m: (n, m, 0)),
            ),
        ),
        compiler_params=pltpu.CompilerParams(
            dimension_semantics=("parallel", "parallel"),
            vmem_limit_bytes=VMEM_LIMIT),
    )(patches, w2, b2)

    # ---- batch-norm statistics (training mode: batch stats, biased var) ----
    count = N * H * W
    mean = jnp.sum(s1, axis=(0, 1)) / count
    var = jnp.sum(s2, axis=(0, 1)) / count - mean * mean
    scale = gamma * lax.rsqrt(var + EPS)
    shift = beta - mean * scale

    # ---- fused BN affine + MaxPool2d(2, 2, pad=1) ---------------------------
    Ho, Wo = H // 2 + 1, W2 + 1
    y_deint = y_flat.reshape(N, H, 2, W2, C_OUT)         # free reinterpretation

    # TODO(synk): for very large spatial sizes on v7x (64 MiB VMEM), add an
    # H-tile grid axis with a 1-row halo (manual DMA) to this pooling kernel.
    pooled = pl.pallas_call(
        _bn_pool_kernel,
        out_shape=jax.ShapeDtypeStruct((N, Ho, Wo, C_OUT), jnp.float32),
        grid_spec=pltpu.PrefetchScalarGridSpec(
            num_scalar_prefetch=0,
            grid=(N,),
            in_specs=[
                pl.BlockSpec((1, H, 2, W2, C_OUT), lambda n: (n, 0, 0, 0, 0)),
                pl.BlockSpec((1, C_OUT), lambda n: (0, 0)),
                pl.BlockSpec((1, C_OUT), lambda n: (0, 0)),
            ],
            out_specs=pl.BlockSpec((1, Ho, Wo, C_OUT), lambda n: (n, 0, 0, 0)),
        ),
        compiler_params=pltpu.CompilerParams(
            dimension_semantics=("parallel",),
            vmem_limit_bytes=VMEM_LIMIT),
    )(y_deint, scale.reshape(1, C_OUT), shift.reshape(1, C_OUT))

    return jnp.transpose(pooled, (0, 3, 1, 2))           # NHWC -> NCHW


def reference(x_nchw, params):
    """Pure-JAX f32 reference of the PyTorch forward, for self-validation."""
    x = jnp.transpose(x_nchw, (0, 2, 3, 1))
    y = lax.conv_general_dilated(
        x, params["w"], window_strides=(1, 1),
        padding=((PAD, PAD), (PAD, PAD)),
        dimension_numbers=("NHWC", "HWIO", "NHWC"),
        precision=lax.Precision.HIGHEST) + params["b"]
    mean = jnp.mean(y, axis=(0, 1, 2))
    var = jnp.mean((y - mean) ** 2, axis=(0, 1, 2))
    yn = (y - mean) / jnp.sqrt(var + EPS) * params["gamma"] + params["beta"]
    yp = jnp.pad(yn, ((0, 0), (1, 1), (1, 1), (0, 0)),
                 constant_values=-jnp.inf)
    pooled = lax.reduce_window(yp, -jnp.inf, lax.max,
                               (1, 2, 2, 1), (1, 2, 2, 1), "VALID")
    return jnp.transpose(pooled, (0, 3, 1, 2))


if __name__ == "__main__":
    key = jax.random.PRNGKey(0)
    k1, k2, k3, k4, k5 = jax.random.split(key, 5)
    params = {
        "w": jax.random.normal(k1, (KH, KW, C_IN, C_OUT), jnp.float32) * 0.05,
        "b": jax.random.normal(k2, (C_OUT,), jnp.float32) * 0.1,
        # gamma may be negative: BN affine is applied before pooling/masking.
        "gamma": 0.5 + 0.5 * jax.random.normal(k3, (C_OUT,), jnp.float32),
        "beta": jax.random.normal(k4, (C_OUT,), jnp.float32) * 0.1,
    }
    # Small shapes consistent with the module (channels 3 -> 192 are fixed).
    x = jax.random.normal(k5, (2, C_IN, 16, 16), jnp.float32)

    out = jax.block_until_ready(jax.jit(model_forward)(x, params))
    ref = jax.block_until_ready(reference(x, params))

    assert out.shape == (2, C_OUT, 9, 9), out.shape
    err = float(jnp.max(jnp.abs(out - ref)))
    assert err < 6e-2, f"max abs err {err}"   # bf16 matmul inputs, f32 accumulate
    print("KERNEL_OK")
</pallas_src>

<mosaic_0001>
module attributes {stable_mosaic.version = 11 : i64} {
  func.func @_conv_kernel(%arg0: i32, %arg1: i32, %arg2: memref<1x256x147xbf16, #tpu.memory_space<vmem>>, %arg3: memref<147x192xbf16, #tpu.memory_space<vmem>>, %arg4: memref<1x192xf32, #tpu.memory_space<vmem>>, %arg5: memref<1x256x192xbf16, #tpu.memory_space<vmem>>, %arg6: memref<1x1x192xf32, #tpu.memory_space<vmem>>, %arg7: memref<1x1x192xf32, #tpu.memory_space<vmem>>) attributes {dimension_semantics = [#tpu.dimension_semantics<parallel>, #tpu.dimension_semantics<parallel>], iteration_bounds = array<i64: 2, 1>, scalar_prefetch = 0 : i64, scratch_operands = 0 : i64, tpu.core_type = #tpu.core_type<tc>, window_params = [{transform_indices = @transform_0, window_bounds = array<i64: 1, 256, 147>}, {pipeline_mode = #tpu.pipeline_mode<synchronous>, transform_indices = @transform_1, window_bounds = array<i64: 147, 192>}, {pipeline_mode = #tpu.pipeline_mode<synchronous>, transform_indices = @transform_2, window_bounds = array<i64: 1, 192>}, {transform_indices = @transform_3, window_bounds = array<i64: 1, 256, 192>}, {transform_indices = @transform_4, window_bounds = array<i64: 1, 1, 192>}, {transform_indices = @transform_5, window_bounds = array<i64: 1, 1, 192>}]} {
    %c0 = arith.constant 0 : index
    %c0_0 = arith.constant 0 : index
    %c0_1 = arith.constant 0 : index
    %0 = vector.load %arg2[%c0, %c0_0, %c0_1] : memref<1x256x147xbf16, #tpu.memory_space<vmem>>, vector<1x256x147xbf16>
    %1 = vector.shape_cast %0 : vector<1x256x147xbf16> to vector<256x147xbf16>
    %c0_2 = arith.constant 0 : index
    %c0_3 = arith.constant 0 : index
    %2 = vector.load %arg3[%c0_2, %c0_3] : memref<147x192xbf16, #tpu.memory_space<vmem>>, vector<147x192xbf16>
    %cst = arith.constant dense<0.000000e+00> : vector<256x192xf32>
    %3 = tpu.matmul %1, %2, %cst {dimension_numbers = #tpu.dot_dimension_numbers<[1], [0], [0], [1], [0, 0, 1, 1], [], []>} : vector<256x147xbf16>, vector<147x192xbf16>, vector<256x192xf32> -> vector<256x192xf32>
    %c0_4 = arith.constant 0 : index
    %c0_5 = arith.constant 0 : index
    %4 = vector.load %arg4[%c0_4, %c0_5] : memref<1x192xf32, #tpu.memory_space<vmem>>, vector<1x192xf32>
    %5 = vector.broadcast %4 : vector<1x192xf32> to vector<256x192xf32>
    %6 = arith.addf %3, %5 : vector<256x192xf32>
    %7 = arith.truncf %6 : vector<256x192xf32> to vector<256x192xbf16>
    %c0_6 = arith.constant 0 : index
    %c0_7 = arith.constant 0 : index
    %c0_8 = arith.constant 0 : index
    %8 = vector.load %arg5[%c0_6, %c0_7, %c0_8] : memref<1x256x192xbf16, #tpu.memory_space<vmem>>, vector<1x256x192xbf16>
    %9 = vector.shape_cast %8 : vector<1x256x192xbf16> to vector<256x192xbf16>
    %10 = vector.shape_cast %7 : vector<256x192xbf16> to vector<1x256x192xbf16>
    tpu.vector_store %arg5[%c0_6, %c0_7, %c0_8], %10 {strides = array<i32>} : memref<1x256x192xbf16, #tpu.memory_space<vmem>>, vector<1x256x192xbf16>,
    %cst_9 = arith.constant dense<0.000000e+00> : vector<192xf32>
    %11 = vector.multi_reduction <add>, %6, %cst_9 [0] : vector<256x192xf32> to vector<192xf32>
    %12 = vector.shape_cast %11 : vector<192xf32> to vector<1x192xf32>
    %c0_10 = arith.constant 0 : index
    %c0_11 = arith.constant 0 : index
    %c0_12 = arith.constant 0 : index
    %13 = vector.load %arg6[%c0_10, %c0_11, %c0_12] : memref<1x1x192xf32, #tpu.memory_space<vmem>>, vector<1x1x192xf32>
    %14 = vector.shape_cast %13 : vector<1x1x192xf32> to vector<1x192xf32>
    %15 = vector.shape_cast %12 : vector<1x192xf32> to vector<1x1x192xf32>
    tpu.vector_store %arg6[%c0_10, %c0_11, %c0_12], %15 {strides = array<i32>} : memref<1x1x192xf32, #tpu.memory_space<vmem>>, vector<1x1x192xf32>,
    %16 = arith.mulf %6, %6 : vector<256x192xf32>
    %cst_13 = arith.constant dense<0.000000e+00> : vector<192xf32>
    %17 = vector.multi_reduction <add>, %16, %cst_13 [0] : vector<256x192xf32> to vector<192xf32>
    %18 = vector.shape_cast %17 : vector<192xf32> to vector<1x192xf32>
    %c0_14 = arith.constant 0 : index
    %c0_15 = arith.constant 0 : index
    %c0_16 = arith.constant 0 : index
    %19 = vector.load %arg7[%c0_14, %c0_15, %c0_16] : memref<1x1x192xf32, #tpu.memory_space<vmem>>, vector<1x1x192xf32>
    %20 = vector.shape_cast %19 : vector<1x1x192xf32> to vector<1x192xf32>
    %21 = vector.shape_cast %18 : vector<1x192xf32> to vector<1x1x192xf32>
    tpu.vector_store %arg7[%c0_14, %c0_15, %c0_16], %21 {strides = array<i32>} : memref<1x1x192xf32, #tpu.memory_space<vmem>>, vector<1x1x192xf32>,
    return
  }
  func.func @transform_0(%arg0: i32, %arg1: i32) -> (i32, i32, i32) {
    %c0_i32 = arith.constant 0 : i32
    %c0_i32_0 = arith.constant 0 : i32
    return %arg0, %arg1, %c0_i32 : i32, i32, i32
  }
  func.func @transform_1(%arg0: i32, %arg1: i32) -> (i32, i32) {
    %c0_i32 = arith.constant 0 : i32
    %c0_i32_0 = arith.constant 0 : i32
    %c0_i32_1 = arith.constant 0 : i32
    return %c0_i32, %c0_i32_0 : i32, i32
  }
  func.func @transform_2(%arg0: i32, %arg1: i32) -> (i32, i32) {
    %c0_i32 = arith.constant 0 : i32
    %c0_i32_0 = arith.constant 0 : i32
    %c0_i32_1 = arith.constant 0 : i32
    return %c0_i32, %c0_i32_0 : i32, i32
  }
  func.func @transform_3(%arg0: i32, %arg1: i32) -> (i32, i32, i32) {
    %c0_i32 = arith.constant 0 : i32
    %c0_i32_0 = arith.constant 0 : i32
    return %arg0, %arg1, %c0_i32 : i32, i32, i32
  }
  func.func @transform_4(%arg0: i32, %arg1: i32) -> (i32, i32, i32) {
    %c0_i32 = arith.constant 0 : i32
    %c0_i32_0 = arith.constant 0 : i32
    return %arg0, %arg1, %c0_i32 : i32, i32, i32
  }
  func.func @transform_5(%arg0: i32, %arg1: i32) -> (i32, i32, i32) {
    %c0_i32 = arith.constant 0 : i32
    %c0_i32_0 = arith.constant 0 : i32
    return %arg0, %arg1, %c0_i32 : i32, i32, i32
  }
}

module attributes {stable_mosaic.version = 11 : i64} {
  func.func @_bn_pool_kernel(%arg0: i32, %arg1: memref<1x16x2x8x192xbf16, #tpu.memory_space<vmem>>, %arg2: memref<1x192xf32, #tpu.memory_space<vmem>>, %arg3: memref<1x192xf32, #tpu.memory_space<vmem>>, %arg4: memref<1x9x9x192xf32, #tpu.memory_space<vmem>>) attributes {dimension_semantics = [#tpu.dimension_semantics<parallel>], iteration_bounds = array<i64: 2>, scalar_prefetch = 0 : i64, scratch_operands = 0 : i64, tpu.core_type = #tpu.core_type<tc>, window_params = [{transform_indices = @transform_0, window_bounds = array<i64: 1, 16, 2, 8, 192>}, {pipeline_mode = #tpu.pipeline_mode<synchronous>, transform_indices = @transform_1, window_bounds = array<i64: 1, 192>}, {pipeline_mode = #tpu.pipeline_mode<synchronous>, transform_indices = @transform_2, window_bounds = array<i64: 1, 192>}, {transform_indices = @transform_3, window_bounds = array<i64: 1, 9, 9, 192>}]} {
    %c0 = arith.constant 0 : index
    %c0_0 = arith.constant 0 : index
    %c0_1 = arith.constant 0 : index
    %c0_2 = arith.constant 0 : index
    %c0_3 = arith.constant 0 : index
    %0 = vector.load %arg1[%c0, %c0_0, %c0_1, %c0_2, %c0_3] : memref<1x16x2x8x192xbf16, #tpu.memory_space<vmem>>, vector<1x16x2x8x192xbf16>
    %1 = vector.shape_cast %0 : vector<1x16x2x8x192xbf16> to vector<16x2x8x192xbf16>
    %2 = arith.extf %1 : vector<16x2x8x192xbf16> to vector<16x2x8x192xf32>
    %c0_4 = arith.constant 0 : index
    %c0_5 = arith.constant 0 : index
    %3 = vector.load %arg2[%c0_4, %c0_5] : memref<1x192xf32, #tpu.memory_space<vmem>>, vector<1x192xf32>
    %4 = vector.shape_cast %3 : vector<1x192xf32> to vector<1x1x1x192xf32>
    %5 = vector.broadcast %4 : vector<1x1x1x192xf32> to vector<16x2x8x192xf32>
    %6 = arith.mulf %2, %5 : vector<16x2x8x192xf32>
    %c0_6 = arith.constant 0 : index
    %c0_7 = arith.constant 0 : index
    %7 = vector.load %arg3[%c0_6, %c0_7] : memref<1x192xf32, #tpu.memory_space<vmem>>, vector<1x192xf32>
    %8 = vector.shape_cast %7 : vector<1x192xf32> to vector<1x1x1x192xf32>
    %9 = vector.broadcast %8 : vector<1x1x1x192xf32> to vector<16x2x8x192xf32>
    %10 = arith.addf %6, %9 : vector<16x2x8x192xf32>
    %11 = vector.extract_strided_slice %10 {offsets = [0, 0, 0, 0], sizes = [16, 1, 8, 192], strides = [1, 1, 1, 1]} : vector<16x2x8x192xf32> to vector<16x1x8x192xf32>
    %12 = vector.shape_cast %11 : vector<16x1x8x192xf32> to vector<16x8x192xf32>
    %13 = vector.extract_strided_slice %10 {offsets = [0, 1, 0, 0], sizes = [16, 1, 8, 192], strides = [1, 1, 1, 1]} : vector<16x2x8x192xf32> to vector<16x1x8x192xf32>
    %14 = vector.shape_cast %13 : vector<16x1x8x192xf32> to vector<16x8x192xf32>
    %15 = vector.extract_strided_slice %12 {offsets = [1, 0, 0], sizes = [14, 8, 192], strides = [1, 1, 1]} : vector<16x8x192xf32> to vector<14x8x192xf32>
    %16 = vector.shape_cast %15 : vector<14x8x192xf32> to vector<7x2x8x192xf32>
    %cst = arith.constant dense<0xFF800000> : vector<7x8x192xf32>
    %17 = vector.multi_reduction <maximumf>, %16, %cst [1] : vector<7x2x8x192xf32> to vector<7x8x192xf32>
    %18 = vector.extract_strided_slice %12 {offsets = [0, 0, 0], sizes = [1, 8, 192], strides = [1, 1, 1]} : vector<16x8x192xf32> to vector<1x8x192xf32>
    %19 = vector.extract_strided_slice %12 {offsets = [15, 0, 0], sizes = [1, 8, 192], strides = [1, 1, 1]} : vector<16x8x192xf32> to vector<1x8x192xf32>
    %20 = tpu.concatenate %18, %17, %19 in 0 : vector<1x8x192xf32>, vector<7x8x192xf32>, vector<1x8x192xf32> -> vector<9x8x192xf32>
    %21 = vector.extract_strided_slice %14 {offsets = [1, 0, 0], sizes = [14, 8, 192], strides = [1, 1, 1]} : vector<16x8x192xf32> to vector<14x8x192xf32>
    %22 = vector.shape_cast %21 : vector<14x8x192xf32> to vector<7x2x8x192xf32>
    %cst_8 = arith.constant dense<0xFF800000> : vector<7x8x192xf32>
    %23 = vector.multi_reduction <maximumf>, %22, %cst_8 [1] : vector<7x2x8x192xf32> to vector<7x8x192xf32>
    %24 = vector.extract_strided_slice %14 {offsets = [0, 0, 0], sizes = [1, 8, 192], strides = [1, 1, 1]} : vector<16x8x192xf32> to vector<1x8x192xf32>
    %25 = vector.extract_strided_slice %14 {offsets = [15, 0, 0], sizes = [1, 8, 192], strides = [1, 1, 1]} : vector<16x8x192xf32> to vector<1x8x192xf32>
    %26 = tpu.concatenate %24, %23, %25 in 0 : vector<1x8x192xf32>, vector<7x8x192xf32>, vector<1x8x192xf32> -> vector<9x8x192xf32>
    %27 = vector.extract_strided_slice %20 {offsets = [0, 0, 0], sizes = [9, 1, 192], strides = [1, 1, 1]} : vector<9x8x192xf32> to vector<9x1x192xf32>
    %c0_9 = arith.constant 0 : index
    %c0_10 = arith.constant 0 : index
    %c0_11 = arith.constant 0 : index
    %c0_12 = arith.constant 0 : index
    %28 = vector.load %arg4[%c0_9, %c0_10, %c0_11, %c0_12] : memref<1x9x9x192xf32, #tpu.memory_space<vmem>>, vector<1x9x1x192xf32>
    %29 = vector.shape_cast %28 : vector<1x9x1x192xf32> to vector<9x1x192xf32>
    %30 = vector.shape_cast %27 : vector<9x1x192xf32> to vector<1x9x1x192xf32>
    tpu.vector_store %arg4[%c0_9, %c0_10, %c0_11, %c0_12], %30 {strides = array<i32>} : memref<1x9x9x192xf32, #tpu.memory_space<vmem>>, vector<1x9x1x192xf32>,
    %31 = vector.extract_strided_slice %26 {offsets = [0, 0, 0], sizes = [9, 7, 192], strides = [1, 1, 1]} : vector<9x8x192xf32> to vector<9x7x192xf32>
    %32 = vector.extract_strided_slice %20 {offsets = [0, 1, 0], sizes = [9, 7, 192], strides = [1, 1, 1]} : vector<9x8x192xf32> to vector<9x7x192xf32>
    %33 = arith.maximumf %31, %32 : vector<9x7x192xf32>
    %c0_13 = arith.constant 0 : index
    %c0_14 = arith.constant 0 : index
    %c1 = arith.constant 1 : index
    %c0_15 = arith.constant 0 : index
    %34 = vector.load %arg4[%c0_13, %c0_14, %c1, %c0_15] : memref<1x9x9x192xf32, #tpu.memory_space<vmem>>, vector<1x9x7x192xf32>
    %35 = vector.shape_cast %34 : vector<1x9x7x192xf32> to vector<9x7x192xf32>
    %36 = vector.shape_cast %33 : vector<9x7x192xf32> to vector<1x9x7x192xf32>
    tpu.vector_store %arg4[%c0_13, %c0_14, %c1, %c0_15], %36 {strides = array<i32>} : memref<1x9x9x192xf32, #tpu.memory_space<vmem>>, vector<1x9x7x192xf32>,
    %37 = vector.extract_strided_slice %26 {offsets = [0, 7, 0], sizes = [9, 1, 192], strides = [1, 1, 1]} : vector<9x8x192xf32> to vector<9x1x192xf32>
    %c0_16 = arith.constant 0 : index
    %c0_17 = arith.constant 0 : index
    %c8 = arith.constant 8 : index
    %c0_18 = arith.constant 0 : index
    %38 = vector.load %arg4[%c0_16, %c0_17, %c8, %c0_18] : memref<1x9x9x192xf32, #tpu.memory_space<vmem>>, vector<1x9x1x192xf32>
    %39 = vector.shape_cast %38 : vector<1x9x1x192xf32> to vector<9x1x192xf32>
    %40 = vector.shape_cast %37 : vector<9x1x192xf32> to vector<1x9x1x192xf32>
    tpu.vector_store %arg4[%c0_16, %c0_17, %c8, %c0_18], %40 {strides = array<i32>} : memref<1x9x9x192xf32, #tpu.memory_space<vmem>>, vector<1x9x1x192xf32>,
    return
  }
  func.func @transform_0(%arg0: i32) -> (i32, i32, i32, i32, i32) {
    %c0_i32 = arith.constant 0 : i32
    %c0_i32_0 = arith.constant 0 : i32
    %c0_i32_1 = arith.constant 0 : i32
    %c0_i32_2 = arith.constant 0 : i32
    %c0_i32_3 = arith.constant 0 : i32
    return %arg0, %c0_i32, %c0_i32_0, %c0_i32_1, %c0_i32_2 : i32, i32, i32, i32, i32
  }
  func.func @transform_1(%arg0: i32) -> (i32, i32) {
    %c0_i32 = arith.constant 0 : i32
    %c0_i32_0 = arith.constant 0 : i32
    %c0_i32_1 = arith.constant 0 : i32
    return %c0_i32, %c0_i32_0 : i32, i32
  }
  func.func @transform_2(%arg0: i32) -> (i32, i32) {
    %c0_i32 = arith.constant 0 : i32
    %c0_i32_0 = arith.constant 0 : i32
    %c0_i32_1 = arith.constant 0 : i32
    return %c0_i32, %c0_i32_0 : i32, i32
  }
  func.func @transform_3(%arg0: i32) -> (i32, i32, i32, i32) {
    %c0_i32 = arith.constant 0 : i32
    %c0_i32_0 = arith.constant 0 : i32
    %c0_i32_1 = arith.constant 0 : i32
    %c0_i32_2 = arith.constant 0 : i32
    return %arg0, %c0_i32, %c0_i32_0, %c0_i32_1 : i32, i32, i32, i32
  }
}

</mosaic_0001>

<bundles_post_ra>
// kernel: model_forward.3
= control target key start
LH: loop header
LB: loop body
LE: loop exit
PB: predicated region body
PF: predicated region fallthrough
CT: control target
= control target key end

     0   :  { %s869_s12 = smov 0   ;;  %s1332_s0 = inlined_call_operand.vmem [shape: bf16[2,16,2,8,192], index: 0, kind: input, shape index: {}]   ;;  %s1333_s1 = inlined_call_operand.vmem [shape: f32[1,192], index: 1, kind: input, shape index: {}]   ;;  %s1334_s2 = inlined_call_operand.vmem [shape: f32[1,192], index: 2, kind: input, shape index: {}]   ;;  %s1335_s3 = inlined_call_operand.vmem [shape: f32[2,9,9,192], index: 3, kind: output, shape index: {}]  }
   0x1 LB: > { %s804_s13 = sadd.s32 4294967295, %s847_s12   ;;  %p808_p0 = scmp.ge.s32.totalorder %s847_s12, 1  ;;  %s847_s12 = sphi %s869_s12, %s13_s12  }
   0x2   : > { %p137_p1 = scmp.lt.s32.totalorder %s847_s12, 3 }
   0x4   : > { %p138_p2 = pnand %p808_p0, %p137_p1 }
   0x5   : > { %p161_p3 = scmp.lt.s32.totalorder (!%p138_p2), %s804_s13, 1 }
   0x6   : > { %141 = sbr.rel (%p138_p2) target bundleno = 111 (0x6f), region = 32 }
   0xb   : > { %s1339_s13 = smov (!%p161_p3, %s804_s13), 1  ;;  %v267_v0 = vld [vmem:[%s1333_s1] sm:$0x3]  ;;  %vm408_vm0 = vcmask 523264   ;;  %v510_v35 = vlaneseq  ;;  %vm491_vm2 = vcmask 1040384   ;;  %vm649_vm3 = vcmask 523265  }
   0xc   : > { %v337_v1 = vld [vmem:[%s1334_s2] sm:$0x3]  ;;  %s831_s18 = sshll.u32 %s1339_s13, 8  ;;  %v891_v2 = vperm.slane %v267_v0, 0  ;;  %v893_v3 = vperm.slane %v267_v0, 1  ;;  %s832_s22 = smul.u32 288, %s1339_s13 }
   0xd   : > { %s889_s21 = scalar_lea.vmem %s1332_s0, %s831_s18  ;;  %v896_v5 = vperm.slane %v337_v1, 0  ;;  %v899_v9 = vperm.slane %v337_v1, 1  ;;  %vm938_vm1 = vcmp.lt.s32.totalorder %v510_v35, 192 }
   0xe   : > { %v172_v4 = vld [vmem:[%s889_s21 + $0x8] sm:$0xff]  ;;  %v174_v6 = vld [vmem:[%s889_s21 + $0x18] sm:$0xff]  ;;  %s936_s25 = scalar_lea.vmem %s1335_s3, %s832_s22  ;;  %v954_v54 = vld [vmem:[%s889_s21] sm:$0xff] }
   0xf   : > { %v205_v7 = vunpack.c.l.bf16 %v172_v4  ;;  %v206_v8 = vunpack.c.h.bf16 %v172_v4  ;;  %v176_v10 = vld [vmem:[%s889_s21 + $0x28] sm:$0xff]  ;;  %v209_v11 = vunpack.c.l.bf16 %v174_v6  ;;  %v210_v13 = vunpack.c.h.bf16 %v174_v6  ;;  %v178_v23 = vld [vmem:[%s889_s21 + $0x38] sm:$0xff] }
  0x10   : > { %v213_v12 = vunpack.c.l.bf16 %v176_v10  ;;  %v214_v14 = vunpack.c.h.bf16 %v176_v10  ;;  %v180_v24 = vld [vmem:[%s889_s21 + $0x48] sm:$0xff]  ;;  %v218_v29 = vunpack.c.h.bf16 %v178_v23  ;;  %v217_v33 = vunpack.c.l.bf16 %v178_v23  ;;  %v182_v44 = vld [vmem:[%s889_s21 + $0x58] sm:$0xff] }
  0x11   : > { %v275_v15 = vmul.f32 %v891_v2, %v205_v7  ;;  %v276_v16 = vmul.f32 %v893_v3, %v206_v8  ;;  %v279_v17 = vmul.f32 %v891_v2, %v209_v11  ;;  %v280_v19 = vmul.f32 %v893_v3, %v210_v13  ;;  %v184_v45 = vld [vmem:[%s889_s21 + $0x68] sm:$0xff]  ;;  %v186_v0 = vld [vmem:[%s889_s21 + $0x78] sm:$0xff] }
  0x12   : > { %v283_v18 = vmul.f32 %v891_v2, %v213_v12  ;;  %v284_v20 = vmul.f32 %v893_v3, %v214_v14  ;;  %v222_v30 = vunpack.c.h.bf16 %v180_v24  ;;  %v221_v34 = vunpack.c.l.bf16 %v180_v24  ;;  %v188_v1 = vld [vmem:[%s889_s21 + $0x88] sm:$0xff] }
  0x13   : > { %v909_v21 = vadd.f32 %v896_v5, %v275_v15  ;;  %v912_v22 = vadd.f32 %v899_v9, %v276_v16  ;;  %v350_v25 = vadd.f32 %v899_v9, %v280_v19  ;;  %v349_v27 = vadd.f32 %v896_v5, %v279_v17  ;;  %v190_v15 = vld [vmem:[%s889_s21 + $0x98] sm:$0xff]  ;;  %v192_v17 = vld [vmem:[%s889_s21 + $0xa8] sm:$0xff] }
  0x14   : > { %v354_v26 = vadd.f32 %v899_v9, %v284_v20  ;;  %v353_v28 = vadd.f32 %v896_v5, %v283_v18  ;;  %v288_v37 = vmul.f32 %v893_v3, %v218_v29  ;;  %v292_v38 = vmul.f32 %v893_v3, %v222_v30  ;;  %v194_v18 = vld [vmem:[%s889_s21 + $0xb8] sm:$0xff]  ;;  %v196_v19 = vld [vmem:[%s889_s21 + $0xc8] sm:$0xff] }
  0x15   : > { %685 = vst [vmem:[#allocation1] sm:$0xff] %v909_v21  ;;  %v437_v31 = vsel %vm408_vm0, %v350_v25, -inf  ;;  %v287_v40 = vmul.f32 %v891_v2, %v217_v33  ;;  %v291_v41 = vmul.f32 %v891_v2, %v221_v34  ;;  %v226_v50 = vunpack.c.h.bf16 %v182_v44 }
  0x16   : > { %686 = vst [vmem:[#allocation1 + $0x9] sm:$0xff] %v912_v22  ;;  %v438_v32 = vsel %vm408_vm0, %v354_v26, -inf  ;;  %v925_v36 = vmax.f32 %v349_v27, %v353_v28  ;;  %v358_v46 = vadd.f32 %v899_v9, %v288_v37  ;;  %v362_v47 = vadd.f32 %v899_v9, %v292_v38  ;;  %v198_v38 = vld [vmem:[%s889_s21 + $0xd8] sm:$0xff] }
  0x17   : > { %v929_v39 = vmax.f32 %v437_v31, %v438_v32  ;;  %v357_v48 = vadd.f32 %v896_v5, %v287_v40  ;;  %v361_v49 = vadd.f32 %v896_v5, %v291_v41  ;;  %v230_v51 = vunpack.c.h.bf16 %v184_v45  ;;  %v200_v40 = vld [vmem:[%s889_s21 + $0xe8] sm:$0xff] }
  0x18   : > { %v225_v52 = vunpack.c.l.bf16 %v182_v44  ;;  %v229_v53 = vunpack.c.l.bf16 %v184_v45  ;;  %v441_v55 = vsel %vm408_vm0, %v358_v46, -inf  ;;  %v442_v56 = vsel %vm408_vm0, %v362_v47, -inf }
  0x19   : > { %v958_v57 = vmax.f32 %v357_v48, %v361_v49  ;;  %v296_v58 = vmul.f32 %v893_v3, %v226_v50  ;;  %v300_v59 = vmul.f32 %v893_v3, %v230_v51  ;;  %v204_v60 = vunpack.c.h.bf16 %v954_v54 }
  0x1a   : > { %v963_v61 = vmax.f32 %v441_v55, %v442_v56  ;;  %v295_v62 = vmul.f32 %v891_v2, %v225_v52  ;;  %v299_v63 = vmul.f32 %v891_v2, %v229_v53  ;;  %v234_v8 = vunpack.c.h.bf16 %v186_v0 }
  0x1b   : > { %v366_v6 = vadd.f32 %v899_v9, %v296_v58  ;;  %v370_v7 = vadd.f32 %v899_v9, %v300_v59  ;;  %v238_v10 = vunpack.c.h.bf16 %v188_v1  ;;  %v274_v11 = vmul.f32 %v893_v3, %v204_v60 }
  0x1c   : > { %v365_v12 = vadd.f32 %v896_v5, %v295_v62  ;;  %v369_v13 = vadd.f32 %v896_v5, %v299_v63  ;;  %v233_v14 = vunpack.c.l.bf16 %v186_v0  ;;  %v237_v16 = vunpack.c.l.bf16 %v188_v1 }
  0x1d   : > { %v688_v42 = vld [vmem:[#allocation1 + $0x7] ss:$9 sm:$0xff]  ;;  %v445_v20 = vsel %vm408_vm0, %v366_v6, -inf  ;;  %v446_v23 = vsel %vm408_vm0, %v370_v7, -inf  ;;  %v304_v24 = vmul.f32 %v893_v3, %v234_v8  ;;  %v308_v25 = vmul.f32 %v893_v3, %v238_v10 }
  0x1e   : > { %689 = vst [vmem:[#allocation1] sm:$0xff] %v925_v36  ;;  %v988_v26 = vadd.f32 %v899_v9, %v274_v11  ;;  %v990_v27 = vmax.f32 %v365_v12, %v369_v13  ;;  %v303_v28 = vmul.f32 %v891_v2, %v233_v14  ;;  %v242_v29 = vunpack.c.h.bf16 %v190_v15 }
  0x1f   : > { %690 = vst [vmem:[#allocation1 + $0x9] sm:$0xff] %v929_v39  ;;  %v246_v30 = vunpack.c.h.bf16 %v192_v17  ;;  %v250_v31 = vunpack.c.h.bf16 %v194_v18  ;;  %v254_v32 = vunpack.c.h.bf16 %v196_v19  ;;  %v993_v33 = vmax.f32 %v445_v20, %v446_v23 }
  0x20   : > { %820 = vst.msk [vmem:[%s936_s25 + $0x10] ss:$8 sm:$0x3] %vm938_vm1, %v688_v42  ;;  %v307_v34 = vmul.f32 %v891_v2, %v237_v16  ;;  %v241_v35 = vunpack.c.l.bf16 %v190_v15  ;;  %v245_v37 = vunpack.c.l.bf16 %v192_v17  ;;  %v374_v42 = vadd.f32 %v899_v9, %v304_v24 }
  0x21   : > { %v378_v44 = vadd.f32 %v899_v9, %v308_v25  ;;  %v249_v45 = vunpack.c.l.bf16 %v194_v18  ;;  %v253_v46 = vunpack.c.l.bf16 %v196_v19  ;;  %v257_v47 = vunpack.c.l.bf16 %v198_v38 }
  0x22   : > { %v261_v48 = vunpack.c.l.bf16 %v200_v40  ;;  %v258_v49 = vunpack.c.h.bf16 %v198_v38  ;;  %v262_v50 = vunpack.c.h.bf16 %v200_v40  ;;  %v312_v51 = vmul.f32 %v893_v3, %v242_v29 }
  0x23   : > { %v316_v52 = vmul.f32 %v893_v3, %v246_v30  ;;  %v320_v53 = vmul.f32 %v893_v3, %v250_v31  ;;  %v324_v55 = vmul.f32 %v893_v3, %v254_v32  ;;  %v373_v56 = vadd.f32 %v896_v5, %v303_v28 }
  0x24   : > { %v377_v58 = vadd.f32 %v896_v5, %v307_v34  ;;  %v311_v59 = vmul.f32 %v891_v2, %v241_v35  ;;  %v315_v60 = vmul.f32 %v891_v2, %v245_v37  ;;  %v449_v62 = vsel %vm408_vm0, %v374_v42, -inf  ;;  %v202_v37 = vld [vmem:[%s889_s21 + $0xf8] sm:$0xff] }
  0x25   : > { %v450_v63 = vsel %vm408_vm0, %v378_v44, -inf  ;;  %v328_v0 = vmul.f32 %v893_v3, %v258_v49  ;;  %v332_v1 = vmul.f32 %v893_v3, %v262_v50  ;;  %v323_v6 = vmul.f32 %v891_v2, %v253_v46  ;;  %v177_v49 = vld [vmem:[%s889_s21 + $0x30] sm:$0xff] }
  0x26   : > { %v691_v4 = vld [vmem:[#allocation1 + $0x7] ss:$9 sm:$0xff]  ;;  %v327_v7 = vmul.f32 %v891_v2, %v257_v47  ;;  %v331_v8 = vmul.f32 %v891_v2, %v261_v48  ;;  %v382_v10 = vadd.f32 %v899_v9, %v312_v51  ;;  %v386_v11 = vadd.f32 %v899_v9, %v316_v52 }
  0x27   : > { %821 = vst.msk [vmem:[%s936_s25 + $0x30] ss:$8 sm:$0x3] %vm938_vm1, %v691_v4  ;;  %v319_v4 = vmul.f32 %v891_v2, %v249_v45  ;;  %v390_v12 = vadd.f32 %v899_v9, %v320_v53  ;;  %v394_v13 = vadd.f32 %v899_v9, %v324_v55  ;;  %v541_v14 = vrot.slane %v988_v26, 1  ;;  %v173_v47 = vld [vmem:[%s889_s21 + $0x10] sm:$0xff]  ;;  %v175_v48 = vld [vmem:[%s889_s21 + $0x20] sm:$0xff] }
  0x28   : > { %692 = vst [vmem:[#allocation1] sm:$0xff] %v958_v57  ;;  %v1026_v15 = vmax.f32 %v373_v56, %v377_v58  ;;  %v381_v16 = vadd.f32 %v896_v5, %v311_v59  ;;  %v1029_v17 = vmax.f32 %v449_v62, %v450_v63  ;;  %v385_v18 = vadd.f32 %v896_v5, %v315_v60  ;;  %v179_v55 = vld [vmem:[%s889_s21 + $0x40] sm:$0xff] }
  0x29   : > { %693 = vst [vmem:[#allocation1 + $0x9] sm:$0xff] %v963_v61  ;;  %v398_v19 = vadd.f32 %v899_v9, %v328_v0  ;;  %v402_v20 = vadd.f32 %v899_v9, %v332_v1  ;;  %v389_v23 = vadd.f32 %v896_v5, %v319_v4  ;;  %v393_v24 = vadd.f32 %v896_v5, %v323_v6 }
  0x2a   : > { %v397_v25 = vadd.f32 %v896_v5, %v327_v7  ;;  %v401_v28 = vadd.f32 %v896_v5, %v331_v8  ;;  %v453_v30 = vsel %vm408_vm0, %v382_v10, -inf  ;;  %v454_v31 = vsel %vm408_vm0, %v386_v11, -inf }
  0x2b   : > { %v457_v32 = vsel %vm408_vm0, %v390_v12, -inf  ;;  %v458_v34 = vsel %vm408_vm0, %v394_v13, -inf  ;;  %v1043_v35 = vmax.f32 %v912_v22, %v541_v14  ;;  %v1050_v38 = vmax.f32 %v381_v16, %v385_v18 }
  0x2c   : > { %v461_v40 = vsel %vm408_vm0, %v398_v19, -inf  ;;  %v265_v42 = vunpack.c.l.bf16 %v202_v37  ;;  %v1055_v44 = vmax.f32 %v453_v30, %v454_v31  ;;  %v1057_v22 = vmax.f32 %v389_v23, %v393_v24 }
  0x2d   : > { %v1059_v45 = vmax.f32 %v457_v32, %v458_v34  ;;  %v1061_v46 = vmax.f32 %v397_v25, %v401_v28  ;;  %v266_v51 = vunpack.c.h.bf16 %v202_v37  ;;  %v208_v52 = vunpack.c.h.bf16 %v173_v47  ;;  %v181_v28 = vld [vmem:[%s889_s21 + $0x50] sm:$0xff]  ;;  %v183_v32 = vld [vmem:[%s889_s21 + $0x60] sm:$0xff] }
  0x2e   : > { %v335_v50 = vmul.f32 %v891_v2, %v265_v42  ;;  %v212_v53 = vunpack.c.h.bf16 %v175_v48  ;;  %v207_v58 = vunpack.c.l.bf16 %v173_v47  ;;  %v211_v59 = vunpack.c.l.bf16 %v175_v48 }
  0x2f   : > { %v215_v60 = vunpack.c.l.bf16 %v177_v49  ;;  %v278_v63 = vmul.f32 %v893_v3, %v208_v52  ;;  %v216_v1 = vunpack.c.h.bf16 %v177_v49  ;;  %v203_v4 = vunpack.c.l.bf16 %v954_v54  ;;  %v185_v49 = vld [vmem:[%s889_s21 + $0x70] sm:$0xff] }
  0x30   : > { %v694_v41 = vld [vmem:[#allocation1 + $0x7] ss:$9 sm:$0xff]  ;;  %v1071_v62 = vadd.f32 %v896_v5, %v335_v50  ;;  %v282_v0 = vmul.f32 %v893_v3, %v212_v53  ;;  %v277_v6 = vmul.f32 %v891_v2, %v207_v58  ;;  %v281_v7 = vmul.f32 %v891_v2, %v211_v59 }
  0x31   : > { %822 = vst.msk [vmem:[%s936_s25 + $0x50] ss:$8 sm:$0x3] %vm938_vm1, %v694_v41  ;;  %v462_v41 = vsel %vm408_vm0, %v402_v20, -inf  ;;  %v219_v8 = vunpack.c.l.bf16 %v179_v55  ;;  %v1079_v10 = vmul.f32 %v893_v3, %v266_v51  ;;  %v348_v11 = vadd.f32 %v899_v9, %v278_v63  ;;  %v187_v63 = vld [vmem:[%s889_s21 + $0x80] sm:$0xff] }
  0x32   : > { %695 = vst [vmem:[#allocation1] sm:$0xff] %v990_v27  ;;  %v1068_v56 = vmax.f32 %v461_v40, %v462_v41  ;;  %v352_v12 = vadd.f32 %v899_v9, %v282_v0  ;;  %v220_v13 = vunpack.c.h.bf16 %v179_v55  ;;  %v273_v14 = vmul.f32 %v891_v2, %v203_v4 }
  0x33   : > { %696 = vst [vmem:[#allocation1 + $0x9] sm:$0xff] %v993_v33  ;;  %v347_v54 = vadd.f32 %v896_v5, %v277_v6  ;;  %v351_v16 = vadd.f32 %v896_v5, %v281_v7  ;;  %v285_v18 = vmul.f32 %v891_v2, %v215_v60  ;;  %v409_v20 = vsel %vm408_vm0, %v348_v11, -inf }
  0x34   : > { %v410_v23 = vsel %vm408_vm0, %v352_v12, -inf  ;;  %v286_v24 = vmul.f32 %v893_v3, %v216_v1  ;;  %v289_v25 = vmul.f32 %v891_v2, %v219_v8  ;;  %v482_v30 = vrot.slane %v988_v26, 7 }
  0x35   : > { %v1097_v31 = vmax.f32 %v347_v54, %v351_v16  ;;  %v1103_v34 = vmax.f32 %v409_v20, %v410_v23  ;;  %v290_v37 = vmul.f32 %v893_v3, %v220_v13  ;;  %v355_v40 = vadd.f32 %v896_v5, %v285_v18  ;;  %v189_v18 = vld [vmem:[%s889_s21 + $0x90] sm:$0xff] }
  0x36   : > { %v356_v41 = vadd.f32 %v899_v9, %v286_v24  ;;  %v359_v42 = vadd.f32 %v896_v5, %v289_v25  ;;  %v223_v47 = vunpack.c.l.bf16 %v181_v28  ;;  %v224_v48 = vunpack.c.h.bf16 %v181_v28 }
  0x37   : > { %v483_v50 = vrot.slane %v1103_v34, 7  ;;  %v360_v51 = vadd.f32 %v899_v9, %v290_v37  ;;  %v227_v53 = vunpack.c.l.bf16 %v183_v32  ;;  %v228_v58 = vunpack.c.h.bf16 %v183_v32 }
  0x38   : > { %v413_v52 = vsel %vm408_vm0, %v356_v41, -inf  ;;  %v1119_v55 = vmax.f32 %v355_v40, %v359_v42  ;;  %v293_v59 = vmul.f32 %v891_v2, %v223_v47  ;;  %v294_v60 = vmul.f32 %v893_v3, %v224_v48  ;;  %v191_v40 = vld [vmem:[%s889_s21 + $0xa0] sm:$0xff] }
  0x39   : > { %v493_v0 = vsel %vm491_vm2, %v1097_v31, %v483_v50  ;;  %v414_v1 = vsel %vm408_vm0, %v360_v51, -inf  ;;  %v297_v4 = vmul.f32 %v891_v2, %v227_v53  ;;  %v231_v6 = vunpack.c.l.bf16 %v185_v49 }
  0x3a   : > { %v697_v29 = vld [vmem:[#allocation1 + $0x7] ss:$9 sm:$0xff]  ;;  %812 = vst.msk [vmem:[%s936_s25 + $0x20] ss:$8 sm:$0x3] %vm938_vm1, %v493_v0  ;;  %v1131_v7 = vmax.f32 %v413_v52, %v414_v1  ;;  %v298_v8 = vmul.f32 %v893_v3, %v228_v58  ;;  %v363_v11 = vadd.f32 %v896_v5, %v293_v59  ;;  %v364_v12 = vadd.f32 %v899_v9, %v294_v60 }
  0x3b   : > { %698 = vst [vmem:[#allocation1] sm:$0xff] %v1026_v15  ;;  %v367_v13 = vadd.f32 %v896_v5, %v297_v4  ;;  %v235_v54 = vunpack.c.l.bf16 %v187_v63  ;;  %v236_v16 = vunpack.c.h.bf16 %v187_v63  ;;  %v301_v24 = vmul.f32 %v891_v2, %v231_v6  ;;  %v193_v60 = vld [vmem:[%s889_s21 + $0xb0] sm:$0xff] }
  0x3c   : > { %823 = vst.msk [vmem:[%s936_s25 + $0x70] ss:$8 sm:$0x3] %vm938_vm1, %v697_v29  ;;  %v1094_v29 = vadd.f32 %v896_v5, %v273_v14  ;;  %v232_v14 = vunpack.c.h.bf16 %v185_v49  ;;  %v368_v20 = vadd.f32 %v899_v9, %v298_v8  ;;  %v417_v23 = vsel %vm408_vm0, %v364_v12, -inf }
  0x3d   : > { %699 = vst [vmem:[#allocation1 + $0x9] sm:$0xff] %v1029_v17  ;;  %v1142_v28 = vmax.f32 %v363_v11, %v367_v13  ;;  %v305_v32 = vmul.f32 %v891_v2, %v235_v54  ;;  %v306_v37 = vmul.f32 %v893_v3, %v236_v16  ;;  %v371_v42 = vadd.f32 %v896_v5, %v301_v24  ;;  %v195_v13 = vld [vmem:[%s889_s21 + $0xc0] sm:$0xff] }
  0x3e   : > { %v492_v26 = vsel %vm491_vm2, %v1094_v29, %v482_v30  ;;  %v302_v30 = vmul.f32 %v893_v3, %v232_v14  ;;  %v239_v47 = vunpack.c.l.bf16 %v189_v18  ;;  %v240_v52 = vunpack.c.h.bf16 %v189_v18 }
  0x3f   : > { %514 = vst.msk [vmem:[%s936_s25] ss:$8 sm:$0x3] %vm938_vm1, %v492_v26  ;;  %v418_v26 = vsel %vm408_vm0, %v368_v20, -inf  ;;  %v375_v50 = vadd.f32 %v896_v5, %v305_v32  ;;  %v376_v51 = vadd.f32 %v899_v9, %v306_v37  ;;  %v243_v53 = vunpack.c.l.bf16 %v191_v40 }
  0x40   : > { %v1156_v48 = vmax.f32 %v417_v23, %v418_v26  ;;  %v372_v49 = vadd.f32 %v899_v9, %v302_v30  ;;  %v244_v58 = vunpack.c.h.bf16 %v191_v40  ;;  %v309_v59 = vmul.f32 %v891_v2, %v239_v47  ;;  %v197_v40 = vld [vmem:[%s889_s21 + $0xd0] sm:$0xff] }
  0x41   : > { %v1168_v0 = vmax.f32 %v371_v42, %v375_v50  ;;  %v422_v4 = vsel %vm408_vm0, %v376_v51, -inf  ;;  %v310_v8 = vmul.f32 %v893_v3, %v240_v52  ;;  %v313_v11 = vmul.f32 %v891_v2, %v243_v53 }
  0x42   : > { %v485_v63 = vrot.slane %v1156_v48, 7  ;;  %v421_v1 = vsel %vm408_vm0, %v372_v49, -inf  ;;  %v314_v12 = vmul.f32 %v893_v3, %v244_v58  ;;  %v379_v54 = vadd.f32 %v896_v5, %v309_v59 }
  0x43   : > { %v1172_v6 = vmax.f32 %v421_v1, %v422_v4  ;;  %v247_v16 = vunpack.c.l.bf16 %v193_v60  ;;  %v248_v18 = vunpack.c.h.bf16 %v193_v60  ;;  %v380_v20 = vadd.f32 %v899_v9, %v310_v8 }
  0x44   : > { %v700_v19 = vld [vmem:[#allocation1 + $0x7] ss:$9 sm:$0xff]  ;;  %v495_v14 = vsel %vm491_vm2, %v1142_v28, %v485_v63  ;;  %v383_v23 = vadd.f32 %v896_v5, %v313_v11  ;;  %v384_v24 = vadd.f32 %v899_v9, %v314_v12  ;;  %v252_v30 = vunpack.c.h.bf16 %v195_v13 }
  0x45   : > { %701 = vst [vmem:[#allocation1] sm:$0xff] %v1050_v38  ;;  %v317_v32 = vmul.f32 %v891_v2, %v247_v16  ;;  %v318_v37 = vmul.f32 %v893_v3, %v248_v18  ;;  %v425_v47 = vsel %vm408_vm0, %v380_v20, -inf  ;;  %v255_v60 = vunpack.c.l.bf16 %v197_v40  ;;  %v201_v18 = vld [vmem:[%s889_s21 + $0xf0] sm:$0xff] }
  0x46   : > { %824 = vst.msk [vmem:[%s936_s25 + $0x90] ss:$8 sm:$0x3] %vm938_vm1, %v700_v19  ;;  %v484_v19 = vrot.slane %v1131_v7, 7  ;;  %v1194_v42 = vmax.f32 %v379_v54, %v383_v23  ;;  %v426_v49 = vsel %vm408_vm0, %v384_v24, -inf  ;;  %v322_v53 = vmul.f32 %v893_v3, %v252_v30 }
  0x47   : > { %702 = vst [vmem:[#allocation1 + $0x9] sm:$0xff] %v1055_v44  ;;  %v1201_v51 = vmax.f32 %v425_v47, %v426_v49  ;;  %v387_v58 = vadd.f32 %v896_v5, %v317_v32  ;;  %v388_v59 = vadd.f32 %v899_v9, %v318_v37  ;;  %v256_v63 = vunpack.c.h.bf16 %v197_v40 }
  0x48   : > { %v494_v41 = vsel %vm491_vm2, %v1119_v55, %v484_v19  ;;  %814 = vst.msk [vmem:[%s936_s25 + $0x60] ss:$8 sm:$0x3] %vm938_vm1, %v495_v14  ;;  %v486_v19 = vrot.slane %v1172_v6, 7  ;;  %v392_v11 = vadd.f32 %v899_v9, %v322_v53  ;;  %v325_v14 = vmul.f32 %v891_v2, %v255_v60 }
  0x49   : > { %813 = vst.msk [vmem:[%s936_s25 + $0x40] ss:$8 sm:$0x3] %vm938_vm1, %v494_v41  ;;  %v199_v41 = vld [vmem:[%s889_s21 + $0xe0] sm:$0xff]  ;;  %v487_v4 = vrot.slane %v1201_v51, 7  ;;  %v326_v54 = vmul.f32 %v893_v3, %v256_v63  ;;  %v263_v40 = vunpack.c.l.bf16 %v201_v18 }
  0x4a   : > { %v496_v26 = vsel %vm491_vm2, %v1168_v0, %v486_v19  ;;  %v259_v1 = vunpack.c.l.bf16 %v199_v41  ;;  %v260_v12 = vunpack.c.h.bf16 %v199_v41  ;;  %v1222_v19 = vadd.f32 %v899_v9, %v1079_v10 }
  0x4b   : > { %815 = vst.msk [vmem:[%s936_s25 + $0x80] ss:$8 sm:$0x3] %vm938_vm1, %v496_v26  ;;  %v497_v20 = vsel %vm491_vm2, %v1194_v42, %v487_v4  ;;  %v430_v23 = vsel %vm408_vm0, %v392_v11, -inf  ;;  %v395_v30 = vadd.f32 %v896_v5, %v325_v14  ;;  %v396_v32 = vadd.f32 %v899_v9, %v326_v54 }
  0x4c   : > { %v329_v16 = vmul.f32 %v891_v2, %v259_v1  ;;  %v330_v24 = vmul.f32 %v893_v3, %v260_v12  ;;  %816 = vst.msk [vmem:[%s936_s25 + $0xa0] ss:$8 sm:$0x3] %vm938_vm1, %v497_v20  ;;  %v264_v41 = vunpack.c.h.bf16 %v201_v18  ;;  %v540_v26 = vrot.slane %v1094_v29, 1 }
  0x4d   : > { %v542_v29 = vrot.slane %v1097_v31, 1  ;;  %v543_v11 = vrot.slane %v1103_v34, 1  ;;  %v544_v31 = vrot.slane %v1119_v55, 1  ;;  %v546_v14 = vrot.slane %v1142_v28, 1 }
  0x4e   : > { %v703_v25 = vld [vmem:[#allocation1 + $0x7] ss:$9 sm:$0xff]  ;;  %v399_v37 = vadd.f32 %v896_v5, %v329_v16  ;;  %v400_v10 = vadd.f32 %v899_v9, %v330_v24  ;;  %v334_v60 = vmul.f32 %v893_v3, %v264_v41  ;;  %v576_v63 = vmax.f32 %v909_v21, %v540_v26 }
  0x4f   : > { %704 = vst [vmem:[#allocation1] sm:$0xff] %v1057_v22  ;;  %v578_v21 = vmax.f32 %v925_v36, %v542_v29  ;;  %v579_v55 = vmax.f32 %v929_v39, %v543_v11  ;;  %v580_v54 = vmax.f32 %v958_v57, %v544_v31  ;;  %v547_v28 = vrot.slane %v1156_v48, 1 }
  0x50   : > { %825 = vst.msk [vmem:[%s936_s25 + $0xb0] ss:$8 sm:$0x3] %vm938_vm1, %v703_v25  ;;  %v251_v25 = vunpack.c.l.bf16 %v195_v13  ;;  %v429_v13 = vsel %vm408_vm0, %v388_v59, -inf  ;;  %v434_v53 = vsel %vm408_vm0, %v400_v10, -inf  ;;  %v333_v59 = vmul.f32 %v891_v2, %v263_v40 }
  0x51   : > { %705 = vst [vmem:[#allocation1 + $0x9] sm:$0xff] %v1059_v45  ;;  %v614_v34 = vrot.slane %v578_v21, 7  ;;  %v615_v18 = vrot.slane %v579_v55, 7  ;;  %v548_v39 = vrot.slane %v1168_v0, 1  ;;  %v616_v57 = vrot.slane %v580_v54, 7 }
  0x52   : > { %v321_v52 = vmul.f32 %v891_v2, %v251_v25  ;;  %v1231_v25 = vmax.f32 %v429_v13, %v430_v23  ;;  %v612_v2 = vrot.slane %v576_v63, 7  ;;  %v403_v12 = vadd.f32 %v896_v5, %v333_v59 }
  0x53   : > { %v545_v13 = vrot.slane %v1131_v7, 1  ;;  %v582_v7 = vmax.f32 %v990_v27, %v546_v14  ;;  %v583_v23 = vmax.f32 %v993_v33, %v547_v28  ;;  %v584_v27 = vmax.f32 %v1026_v15, %v548_v39  ;;  %651 = vst [vmem:[%s936_s25 + $0x20] sm:$0xfe] %v614_v34 }
  0x54   : > { %v391_v8 = vadd.f32 %v896_v5, %v321_v52  ;;  %v488_v49 = vrot.slane %v1231_v25, 7  ;;  %v613_v52 = vrot.slane %v1043_v35, 7  ;;  %v432_v35 = vmax.f32 %v395_v30, %v399_v37  ;;  %648 = vst [vmem:[%s936_s25] sm:$0xfe] %v612_v2 }
  0x55   : > { %v581_v16 = vmax.f32 %v963_v61, %v545_v13  ;;  %v549_v61 = vrot.slane %v1172_v6, 1  ;;  %v550_v48 = vrot.slane %v1194_v42, 1  ;;  %v551_v24 = vrot.slane %v1201_v51, 1  ;;  %652 = vst.msk [vmem:[%s936_s25 + $0x28] sm:$0xfe] %vm649_vm3, %v615_v18 }
  0x56   : > { %v428_v47 = vmax.f32 %v387_v58, %v391_v8  ;;  %v1253_v8 = vadd.f32 %v899_v9, %v334_v60  ;;  %650 = vst.msk [vmem:[%s936_s25 + $0x8] sm:$0xfe] %vm649_vm3, %v613_v52  ;;  %v618_v0 = vrot.slane %v582_v7, 7  ;;  %v553_v33 = vrot.slane %v1231_v25, 1 }
  0x57   : > { %v617_v20 = vrot.slane %v581_v16, 7  ;;  %v554_v37 = vrot.slane %v432_v35, 1  ;;  %v619_v6 = vrot.slane %v583_v23, 7  ;;  %v586_v15 = vmax.f32 %v1050_v38, %v550_v48  ;;  %653 = vst [vmem:[%s936_s25 + $0x40] sm:$0xfe] %v616_v57 }
  0x58   : > { %v706_v50 = vld [vmem:[#allocation1 + $0x7] ss:$9 sm:$0xff]  ;;  %v498_v1 = vsel %vm491_vm2, %v428_v47, %v488_v49  ;;  %v490_v9 = vrot.slane %v1253_v8, 7  ;;  %v552_v30 = vrot.slane %v428_v47, 1  ;;  %v587_v42 = vmax.f32 %v1055_v44, %v551_v24  ;;  %655 = vst [vmem:[%s936_s25 + $0x60] sm:$0xfe] %v618_v0 }
  0x59   : > { %707 = vst [vmem:[#allocation1] sm:$0xff] %v1061_v46  ;;  %v620_v51 = vrot.slane %v584_v27, 7  ;;  %v589_v25 = vmax.f32 %v1059_v45, %v553_v33  ;;  %v556_v41 = vrot.slane %v403_v12, 1  ;;  %v622_v38 = vrot.slane %v586_v15, 7 }
  0x5a   : > { %826 = vst.msk [vmem:[%s936_s25 + $0xd0] ss:$8 sm:$0x3] %vm938_vm1, %v706_v50  ;;  %v433_v50 = vsel %vm408_vm0, %v396_v32, -inf  ;;  %v500_v5 = vsel %vm491_vm2, %v403_v12, %v490_v9  ;;  %v585_v32 = vmax.f32 %v1029_v17, %v549_v61  ;;  %v588_v10 = vmax.f32 %v1057_v22, %v552_v30 }
  0x5b   : > { %708 = vst [vmem:[#allocation1 + $0x9] sm:$0xff] %v1068_v56  ;;  %v1246_v4 = vmax.f32 %v433_v50, %v434_v53  ;;  %v590_v44 = vmax.f32 %v1061_v46, %v554_v37  ;;  %v557_v26 = vrot.slane %v1253_v8, 1  ;;  %v623_v22 = vrot.slane %v587_v42, 7 }
  0x5c   : > { %817 = vst.msk [vmem:[%s936_s25 + $0xc0] ss:$8 sm:$0x3] %vm938_vm1, %v498_v1  ;;  %v621_v17 = vrot.slane %v585_v32, 7  ;;  %v624_v49 = vrot.slane %v588_v10, 7  ;;  %v592_v45 = vmax.f32 %v1071_v62, %v556_v41  ;;  %v625_v46 = vrot.slane %v589_v25, 7 }
  0x5d   : > { %v489_v3 = vrot.slane %v1246_v4, 7  ;;  %819 = vst.msk [vmem:[%s936_s25 + $0x100] ss:$8 sm:$0x3] %vm938_vm1, %v500_v5  ;;  %v555_v40 = vrot.slane %v1246_v4, 1  ;;  %v593_v50 = vmax.f32 %v1222_v19, %v557_v26  ;;  %v626_v52 = vrot.slane %v590_v44, 7 }
  0x5e   : > { %654 = vst.msk [vmem:[%s936_s25 + $0x48] sm:$0xfe] %vm649_vm3, %v617_v20 }
  0x5f   : > { %v499_v36 = vsel %vm491_vm2, %v432_v35, %v489_v3  ;;  %656 = vst.msk [vmem:[%s936_s25 + $0x68] sm:$0xfe] %vm649_vm3, %v619_v6  ;;  %v591_v47 = vmax.f32 %v1068_v56, %v555_v40  ;;  %v628_v56 = vrot.slane %v592_v45, 7  ;;  %v629_v59 = vrot.slane %v593_v50, 7 }
  0x60   : > { %818 = vst.msk [vmem:[%s936_s25 + $0xe0] ss:$8 sm:$0x3] %vm938_vm1, %v499_v36 }
  0x61   : > { %657 = vst [vmem:[%s936_s25 + $0x80] sm:$0xfe] %v620_v51  ;;  %v627_v53 = vrot.slane %v591_v47, 7 }
  0x62   : > { %v709_v58 = vld [vmem:[#allocation1 + $0x7] ss:$9 sm:$0xff]  ;;  %658 = vst.msk [vmem:[%s936_s25 + $0x88] sm:$0xfe] %vm649_vm3, %v621_v17 }
  0x63   : > { %710 = vst [vmem:[#allocation1] sm:$0xff] %v1071_v62 }
  0x64   : > { %827 = vst.msk [vmem:[%s936_s25 + $0xf0] ss:$8 sm:$0x3] %vm938_vm1, %v709_v58 }
  0x65   : > { %711 = vst [vmem:[#allocation1 + $0x9] sm:$0xff] %v1222_v19 }
  0x66   : > { %659 = vst [vmem:[%s936_s25 + $0xa0] sm:$0xfe] %v622_v38 }
  0x67   : > { %660 = vst.msk [vmem:[%s936_s25 + $0xa8] sm:$0xfe] %vm649_vm3, %v623_v22 }
  0x68   : > { %661 = vst [vmem:[%s936_s25 + $0xc0] sm:$0xfe] %v624_v49 }
  0x69   : > { %662 = vst.msk [vmem:[%s936_s25 + $0xc8] sm:$0xfe] %vm649_vm3, %v625_v46 }
  0x6a   : > { %663 = vst [vmem:[%s936_s25 + $0xe0] sm:$0xfe] %v626_v52 }
  0x6b   : > { %664 = vst.msk [vmem:[%s936_s25 + $0xe8] sm:$0xfe] %vm649_vm3, %v627_v53 }
  0x6c   : > { %v712_v62 = vld [vmem:[#allocation1 + $0x7] ss:$9 sm:$0xff]  ;;  %665 = vst [vmem:[%s936_s25 + $0x100] sm:$0xfe] %v628_v56 }
  0x6d   : > { %666 = vst.msk [vmem:[%s936_s25 + $0x108] sm:$0xfe] %vm649_vm3, %v629_v59 }
  0x6e   : > { %828 = vst.msk [vmem:[%s936_s25 + $0x110] ss:$8 sm:$0x3] %vm938_vm1, %v712_v62 }
  0x6f PF: > { %s13_s12 = sadd.s32 1, %s847_s12  }
  0x70   : > { %p10_p4 = scmp.ge.s32.totalorder %s13_s12, 4  }
  0x72   :  { %12 = sbr.rel (!%p10_p4) target bundleno = 1 (0x1), region = 80 }

// kernel: model_forward.2
= control target key start
LH: loop header
LB: loop body
LE: loop exit
PB: predicated region body
PF: predicated region fallthrough
CT: control target
= control target key end

     0   :  { %s1949_s18 = smov 0   ;;  %s1951_s19 = smov 0   ;;  %s2545_s0 = inlined_call_operand.vmem [shape: bf16[2,256,147], index: 0, kind: input, shape index: {}]   ;;  %s2546_s1 = inlined_call_operand.vmem [shape: bf16[147,192], index: 1, kind: input, shape index: {}]   ;;  %s2547_s2 = inlined_call_operand.vmem [shape: f32[1,192], index: 2, kind: input, shape index: {}]   ;;  %s2548_s3 = inlined_call_operand.vmem [shape: bf16[2,256,192], index: 3, kind: output, shape index: {0}]   ;;  %s2549_s4 = inlined_call_operand.vmem [shape: f32[2,1,192], index: 4, kind: output, shape index: {1}]   ;;  %s2550_s5 = inlined_call_operand.vmem [shape: f32[2,1,192], index: 5, kind: output, shape index: {2}]  }
   0x1   :  { %s1953_s20 = smov 0  }
   0x2 LB: > { %s28_s21 = sadd.s32 1, %s1912_s19  ;;  %p1576_p0 = scmp.ge.s32.totalorder %s1916_s20, 1  ;;  %s1916_s20 = sphi %s1953_s20, %s16_s20   ;;  %s1912_s19 = sphi %s1951_s19, %s2554_s19   ;;  %s1908_s18 = sphi %s1949_s18, %s2553_s18  }
   0x3   : > { %p30_p1 = scmp.ge.s32.totalorder %s28_s21, 2  ;;  %p218_p2 = scmp.lt.s32.totalorder %s1916_s20, 3 }
   0x5   : > { %s2556_s21 = smov (%p30_p1, %s28_s21), 0  ;;  %p219_p3 = pnand %p1576_p0, %p218_p2 }
   0x6   : > { %p273_p4 = scmp.lt.s32.totalorder (!%p219_p3), %s1908_s18, 1 }
   0x7   : > { %222 = sbr.rel (%p219_p3) target bundleno = 452 (0x1c4), region = 32 }
   0xc   : > { %v1769_v0 = vld [vmem:[%s2546_s1 + $0x70] sm:$0xf]  ;;  %v1866_v1 = vld [vmem:[%s2546_s1 + $0x74] sm:$0xf0]  ;;  %v1865_v2 = vld [vmem:[%s2546_s1 + $0x74] sm:$0xf] }
   0xd   : > { %v1770_v3 = vor.u32 %v1866_v1, %v1769_v0  ;;  %v1771_v4 = vld [vmem:[%s2546_s1 + $0x78] sm:$0xf0]  ;;  %v1761_v5 = vld [vmem:[%s2546_s1 + $0x60] sm:$0xf]  ;;  %v1864_v6 = vld [vmem:[%s2546_s1 + $0x64] sm:$0xf0] }
   0xe   : > { %v1774_v7 = vor.u32 %v1865_v2, %v1771_v4  ;;  %v1863_v8 = vld [vmem:[%s2546_s1 + $0x64] sm:$0xf]  ;;  %v1763_v9 = vld [vmem:[%s2546_s1 + $0x68] sm:$0xf0]  ;;  %v1762_v10 = vor.u32 %v1864_v6, %v1761_v5  ;;  %v1753_v12 = vld [vmem:[%s2546_s1 + $0x50] sm:$0xf] }
   0xf   : > { %666 = vmatpush.bf16.msra.mxu0 %v1770_v3  ;;  %v1766_v11 = vor.u32 %v1863_v8, %v1763_v9  ;;  %v1862_v13 = vld [vmem:[%s2546_s1 + $0x54] sm:$0xf0]  ;;  %v1861_v14 = vld [vmem:[%s2546_s1 + $0x54] sm:$0xf]  ;;  %v1755_v15 = vld [vmem:[%s2546_s1 + $0x58] sm:$0xf0] }
  0x10   : > { %844 = vmatpush.bf16.msra.mxu2 %v1774_v7  ;;  %v361_v16 = vld [vmem:[%s2546_s1 + $0x90] sm:$0x33]  ;;  %v1754_v17 = vor.u32 %v1862_v13, %v1753_v12  ;;  %vm656_vm0 = vcmask 1040384   ;;  %vm657_vm1 = vcmask 1041408   ;;  %v1758_v19 = vor.u32 %v1861_v14, %v1755_v15  ;;  %v1745_v20 = vld [vmem:[%s2546_s1 + $0x40] sm:$0xf] }
  0x11   : > { %v568_v18 = vunpack.c.h.b16 %v361_v16  ;;  %v1860_v21 = vld [vmem:[%s2546_s1 + $0x44] sm:$0xf0]  ;;  %v567_v22 = vunpack.c.l.b16 %v361_v16  ;;  %v1859_v23 = vld [vmem:[%s2546_s1 + $0x44] sm:$0xf]  ;;  %v1747_v24 = vld [vmem:[%s2546_s1 + $0x48] sm:$0xf0] }
  0x12   : > { %v1918_v26 = vmov 65535   ;;  %v1867_v29 = vld [vmem:[%s2546_s1 + $0x84] sm:$0xf]  ;;  %v1779_v30 = vld [vmem:[%s2546_s1 + $0x88] sm:$0xf0]  ;;  %s2558_s18 = smov (!%p273_p4, %s1908_s18), 1  ;;  %v1746_v32 = vor.u32 %v1860_v21, %v1745_v20  ;;  %v1750_v35 = vor.u32 %v1859_v23, %v1747_v24 }
  0x13   : > { %667 = vmatpush.bf16.msra.mxu0 %v1762_v10  ;;  %v588_v25 = vpack.c.b16 %v568_v18, %v568_v18  ;;  %v658_v27 = vsel %vm656_vm0, 4294967295, %v1918_v26  ;;  %v587_v31 = vpack.c.b16 %v567_v22, %v567_v22  ;;  %v1737_v33 = vld [vmem:[%s2546_s1 + $0x30] sm:$0xf]  ;;  %v1858_v36 = vld [vmem:[%s2546_s1 + $0x34] sm:$0xf0]  ;;  %s1817_s24 = sshll.u32 %s2558_s18, 8  ;;  %v1782_v40 = vor.u32 %v1867_v29, %v1779_v30 }
  0x14   : > { %845 = vmatpush.bf16.msra.mxu2 %v1766_v11  ;;  %v659_v28 = vsel %vm657_vm1, %v658_v27, 0  ;;  %v1857_v37 = vld [vmem:[%s2546_s1 + $0x34] sm:$0xf]  ;;  %v1739_v39 = vld [vmem:[%s2546_s1 + $0x38] sm:$0xf0]  ;;  %s2049_s29 = scalar_lea.vmem %s2545_s0, %s1817_s24  ;;  %v1738_v46 = vor.u32 %v1858_v36, %v1737_v33  ;;  %vm607_vm2 = vcmask 154624   ;;  %s2166_s22 = scalar_lea.vmem %s2548_s3, %s1817_s24 }
  0x15   : > { %v664_v34 = vand.u32 %v659_v28, %v588_v25  ;;  %v661_v38 = vand.u32 %v659_v28, %v587_v31  ;;  %v1777_v41 = vld [vmem:[%s2546_s1 + $0x80] sm:$0xf]  ;;  %v1868_v42 = vld [vmem:[%s2546_s1 + $0x84] sm:$0xf0]  ;;  %v1819_v43 = vld [vmem:[%s2049_s29 + $0x4] sm:$0xf]  ;;  %v1742_v47 = vor.u32 %v1857_v37, %v1739_v39 }
  0x16   : > { %v1587_v44 = vld [vmem:[%s2049_s29 + $0x8] sm:$0xf0]  ;;  %v1778_v45 = vor.u32 %v1868_v42, %v1777_v41  ;;  %v1729_v48 = vld [vmem:[%s2546_s1 + $0x20] sm:$0xf]  ;;  %v1856_v49 = vld [vmem:[%s2546_s1 + $0x24] sm:$0xf0] }
  0x17   : > { %668 = vmatpush.bf16.msra.mxu0 %v1754_v17  ;;  %939 = vmatpush.bf16.msra.mxu3 %v664_v34  ;;  %v1590_v50 = vor.u32 %v1819_v43, %v1587_v44  ;;  %v1855_v51 = vld [vmem:[%s2546_s1 + $0x24] sm:$0xf]  ;;  %v1731_v52 = vld [vmem:[%s2546_s1 + $0x28] sm:$0xf0]  ;;  %v1730_v53 = vor.u32 %v1856_v49, %v1729_v48  ;;  %v1721_v55 = vld [vmem:[%s2546_s1 + $0x10] sm:$0xf] }
  0x18   : > { %846 = vmatpush.bf16.msra.mxu2 %v1758_v19  ;;  %761 = vmatpush.bf16.msra.mxu1 %v661_v38  ;;  %v1734_v54 = vor.u32 %v1855_v51, %v1731_v52  ;;  %v1854_v56 = vld [vmem:[%s2546_s1 + $0x14] sm:$0xf0]  ;;  %v1853_v57 = vld [vmem:[%s2546_s1 + $0x14] sm:$0xf]  ;;  %v1723_v58 = vld [vmem:[%s2546_s1 + $0x18] sm:$0xf0] }
  0x19   : > { %v1722_v59 = vor.u32 %v1854_v56, %v1721_v55  ;;  %v1726_v60 = vor.u32 %v1853_v57, %v1723_v58  ;;  %v1713_v61 = vld [vmem:[%s2546_s1] sm:$0xf]  ;;  %v1852_v62 = vld [vmem:[%s2546_s1 + $0x4] sm:$0xf0]  ;;  %v1851_v63 = vld [vmem:[%s2546_s1 + $0x4] sm:$0xf] }
  0x1a   : > { %v1715_v0 = vld [vmem:[%s2546_s1 + $0x8] sm:$0xf0]  ;;  %v1714_v1 = vor.u32 %v1852_v62, %v1713_v61  ;;  %v1585_v2 = vld [vmem:[%s2049_s29] sm:$0xf]  ;;  %v1820_v3 = vld [vmem:[%s2049_s29 + $0x4] sm:$0xf0] }
  0x1b   : > { %669 = vmatpush.bf16.msra.mxu0 %v1746_v32  ;;  %940 = vmatpush.bf16.msra.mxu3 %v1782_v40  ;;  %v1718_v4 = vor.u32 %v1851_v63, %v1715_v0  ;;  %v1821_v5 = vld [vmem:[%s2049_s29 + $0x14] sm:$0xf]  ;;  %v1595_v6 = vld [vmem:[%s2049_s29 + $0x18] sm:$0xf0]  ;;  %v1586_v7 = vor.u32 %v1820_v3, %v1585_v2  ;;  %v1593_v9 = vld [vmem:[%s2049_s29 + $0x10] sm:$0xf] }
  0x1c   : > { %847 = vmatpush.bf16.msra.mxu2 %v1750_v35  ;;  %762 = vmatpush.bf16.msra.mxu1 %v1778_v45  ;;  %v1598_v8 = vor.u32 %v1821_v5, %v1595_v6  ;;  %v1822_v10 = vld [vmem:[%s2049_s29 + $0x14] sm:$0xf0]  ;;  %v1823_v11 = vld [vmem:[%s2049_s29 + $0x24] sm:$0xf]  ;;  %v1603_v12 = vld [vmem:[%s2049_s29 + $0x28] sm:$0xf0] }
  0x1d   : > { %v1594_v13 = vor.u32 %v1822_v10, %v1593_v9  ;;  %v1606_v14 = vor.u32 %v1823_v11, %v1603_v12  ;;  %v1601_v15 = vld [vmem:[%s2049_s29 + $0x20] sm:$0xf]  ;;  %v1824_v16 = vld [vmem:[%s2049_s29 + $0x24] sm:$0xf0]  ;;  %v1825_v17 = vld [vmem:[%s2049_s29 + $0x34] sm:$0xf] }
  0x1e   : > { %1799 = vmatmul.msk.bf16.vlgmr.msra.gmra.mxu3 %vm607_vm2, %v1590_v50  ;;  %v1611_v18 = vld [vmem:[%s2049_s29 + $0x38] sm:$0xf0]  ;;  %v1602_v19 = vor.u32 %v1824_v16, %v1601_v15  ;;  %v1609_v21 = vld [vmem:[%s2049_s29 + $0x30] sm:$0xf]  ;;  %v1826_v22 = vld [vmem:[%s2049_s29 + $0x34] sm:$0xf0] }
  0x1f   : > { %670 = vmatpush.bf16.msra.mxu0 %v1738_v46  ;;  %1783 = vmatmul.msk.bf16.vlgmr.msra.gmra.mxu1 %vm607_vm2, %v1590_v50  ;;  %v1614_v20 = vor.u32 %v1825_v17, %v1611_v18  ;;  %v1827_v23 = vld [vmem:[%s2049_s29 + $0x44] sm:$0xf]  ;;  %v1619_v24 = vld [vmem:[%s2049_s29 + $0x48] sm:$0xf0]  ;;  %v1610_v25 = vor.u32 %v1826_v22, %v1609_v21  ;;  %v1617_v27 = vld [vmem:[%s2049_s29 + $0x40] sm:$0xf] }
  0x20   : > { %848 = vmatpush.bf16.msra.mxu2 %v1742_v47  ;;  %v1622_v26 = vor.u32 %v1827_v23, %v1619_v24  ;;  %v1828_v28 = vld [vmem:[%s2049_s29 + $0x44] sm:$0xf0]  ;;  %v1829_v29 = vld [vmem:[%s2049_s29 + $0x54] sm:$0xf]  ;;  %v1627_v30 = vld [vmem:[%s2049_s29 + $0x58] sm:$0xf0] }
  0x21   : > { %v1618_v31 = vor.u32 %v1828_v28, %v1617_v27  ;;  %v1630_v32 = vor.u32 %v1829_v29, %v1627_v30  ;;  %v1625_v33 = vld [vmem:[%s2049_s29 + $0x50] sm:$0xf]  ;;  %v1830_v34 = vld [vmem:[%s2049_s29 + $0x54] sm:$0xf0]  ;;  %v1831_v35 = vld [vmem:[%s2049_s29 + $0x64] sm:$0xf] }
  0x22   : > { %v1635_v36 = vld [vmem:[%s2049_s29 + $0x68] sm:$0xf0]  ;;  %v1626_v37 = vor.u32 %v1830_v34, %v1625_v33  ;;  %v1633_v39 = vld [vmem:[%s2049_s29 + $0x60] sm:$0xf]  ;;  %v1832_v40 = vld [vmem:[%s2049_s29 + $0x64] sm:$0xf0] }
  0x23   : > { %671 = vmatpush.bf16.msra.mxu0 %v1730_v53  ;;  %v1638_v38 = vor.u32 %v1831_v35, %v1635_v36  ;;  %v1833_v41 = vld [vmem:[%s2049_s29 + $0x74] sm:$0xf]  ;;  %v1643_v42 = vld [vmem:[%s2049_s29 + $0x78] sm:$0xf0]  ;;  %v1634_v43 = vor.u32 %v1832_v40, %v1633_v39  ;;  %v1641_v45 = vld [vmem:[%s2049_s29 + $0x70] sm:$0xf] }
  0x24   : > { %849 = vmatpush.bf16.msra.mxu2 %v1734_v54  ;;  %v1646_v44 = vor.u32 %v1833_v41, %v1643_v42  ;;  %v1834_v46 = vld [vmem:[%s2049_s29 + $0x74] sm:$0xf0]  ;;  %v1835_v47 = vld [vmem:[%s2049_s29 + $0x84] sm:$0xf]  ;;  %v1651_v48 = vld [vmem:[%s2049_s29 + $0x88] sm:$0xf0] }
  0x25   : > { %v1642_v49 = vor.u32 %v1834_v46, %v1641_v45  ;;  %v1654_v50 = vor.u32 %v1835_v47, %v1651_v48  ;;  %v1649_v54 = vld [vmem:[%s2049_s29 + $0x80] sm:$0xf]  ;;  %v1836_v55 = vld [vmem:[%s2049_s29 + $0x84] sm:$0xf0]  ;;  %v1837_v57 = vld [vmem:[%s2049_s29 + $0x94] sm:$0xf] }
  0x26   : > { %v362_v56 = vld [vmem:[%s2547_s2] sm:$0x3]  ;;  %v1659_v58 = vld [vmem:[%s2049_s29 + $0x98] sm:$0xf0]  ;;  %vm1054_vm3 = vcmask 1043456   ;;  %vm1055_vm4 = vcmask 523268  }
  0x27   : > { %672 = vmatpush.bf16.msra.mxu0 %v1722_v59  ;;  %v1650_v59 = vor.u32 %v1836_v55, %v1649_v54  ;;  %v1662_v63 = vor.u32 %v1837_v57, %v1659_v58  ;;  %v2155_v2 = vperm.slane %v362_v56, 1  ;;  %vm2168_vm5 = vmor %vm1055_vm4, %vm1054_vm3  ;;  %v1657_v15 = vld [vmem:[%s2049_s29 + $0x90] sm:$0xf]  ;;  %v1838_v16 = vld [vmem:[%s2049_s29 + $0x94] sm:$0xf0]  ;;  %vm1126_vm6 = vcmask 523264  }
  0x28   : > { %850 = vmatpush.bf16.msra.mxu2 %v1726_v60  ;;  %v2152_v60 = vperm.slane %v362_v56, 0  ;;  %v1658_v23 = vor.u32 %v1838_v16, %v1657_v15  ;;  %v1665_v55 = vld [vmem:[%s2049_s29 + $0xa0] sm:$0xf]  ;;  %v1840_v56 = vld [vmem:[%s2049_s29 + $0xa4] sm:$0xf0]  ;;  %s1581_s24 = sshll.u32 %s2558_s18, 1 }
  0x29   : > { %s301_s25 = scalar_lea.vmem %s2549_s4, %s1581_s24  ;;  %s309_s28 = scalar_lea.vmem %s2550_s5, %s1581_s24 }
  0x2b   : > { %673 = vmatpush.bf16.msra.mxu0 %v1714_v1 }
  0x2c   : > { %851 = vmatpush.bf16.msra.mxu2 %v1718_v4 }
  0x2e   : > { %674 = vmatmul.bf16.vlgmr.msra.gmra.mxu0 %v1586_v7  ;;  %1800 = vmatmul.msk.bf16.gmra.mxu3 %vm607_vm2, %v1598_v8 }
  0x2f   : > { %852 = vmatmul.bf16.vlgmr.msra.gmra.mxu2 %v1586_v7  ;;  %1784 = vmatmul.msk.bf16.gmra.mxu1 %vm607_vm2, %v1598_v8 }
  0x3e   : > { %679 = vmatmul.bf16.gmra.mxu0 %v1594_v13  ;;  %1801 = vmatmul.msk.bf16.gmra.mxu3 %vm607_vm2, %v1606_v14 }
  0x3f   : > { %857 = vmatmul.bf16.gmra.mxu2 %v1594_v13  ;;  %1785 = vmatmul.msk.bf16.gmra.mxu1 %vm607_vm2, %v1606_v14 }
  0x4e   : > { %684 = vmatmul.bf16.gmra.mxu0 %v1602_v19  ;;  %1802 = vmatmul.msk.bf16.gmra.mxu3 %vm607_vm2, %v1614_v20 }
  0x4f   : > { %862 = vmatmul.bf16.gmra.mxu2 %v1602_v19  ;;  %1786 = vmatmul.msk.bf16.gmra.mxu1 %vm607_vm2, %v1614_v20  ;;  %v1839_v19 = vld [vmem:[%s2049_s29 + $0xa4] sm:$0xf]  ;;  %v1667_v20 = vld [vmem:[%s2049_s29 + $0xa8] sm:$0xf0] }
  0x50   : > { %v1670_v28 = vor.u32 %v1839_v19, %v1667_v20 }
  0x5e   : > { %689 = vmatmul.bf16.gmra.mxu0 %v1610_v25  ;;  %1803 = vmatmul.msk.bf16.gmra.mxu3 %vm607_vm2, %v1622_v26 }
  0x5f   : > { %867 = vmatmul.bf16.gmra.mxu2 %v1610_v25  ;;  %1787 = vmatmul.msk.bf16.gmra.mxu1 %vm607_vm2, %v1622_v26 }
  0x6e   : > { %694 = vmatmul.bf16.gmra.mxu0 %v1618_v31  ;;  %1804 = vmatmul.msk.bf16.gmra.mxu3 %vm607_vm2, %v1630_v32 }
  0x6f   : > { %872 = vmatmul.bf16.gmra.mxu2 %v1618_v31  ;;  %1788 = vmatmul.msk.bf16.gmra.mxu1 %vm607_vm2, %v1630_v32 }
  0x7e   : > { %699 = vmatmul.bf16.gmra.mxu0 %v1626_v37  ;;  %1805 = vmatmul.msk.bf16.gmra.mxu3 %vm607_vm2, %v1638_v38 }
  0x7f   : > { %877 = vmatmul.bf16.gmra.mxu2 %v1626_v37  ;;  %1789 = vmatmul.msk.bf16.gmra.mxu1 %vm607_vm2, %v1638_v38 }
  0x8e   : > { %704 = vmatmul.bf16.gmra.mxu0 %v1634_v43  ;;  %1806 = vmatmul.msk.bf16.gmra.mxu3 %vm607_vm2, %v1646_v44 }
  0x8f   : > { %882 = vmatmul.bf16.gmra.mxu2 %v1634_v43  ;;  %1790 = vmatmul.msk.bf16.gmra.mxu1 %vm607_vm2, %v1646_v44 }
  0x9c   : > { %v764_v51 = vpop.f32.mrf.mxu1 }
  0x9e   : > { %709 = vmatmul.bf16.gmra.mxu0 %v1642_v49  ;;  %1807 = vmatmul.msk.bf16.gmra.mxu3 %vm607_vm2, %v1654_v50 }
  0x9f   : > { %887 = vmatmul.bf16.gmra.mxu2 %v1642_v49  ;;  %1791 = vmatmul.msk.bf16.gmra.mxu1 %vm607_vm2, %v1654_v50 }
  0xa1   : > { %v942_v52 = vpop.f32.mrf.mxu3 }
  0xa4   : > { %v766_v53 = vpop.f32.mrf.mxu1 }
  0xa9   : > { %v944_v62 = vpop.f32.mrf.mxu3 }
  0xab   : > { %v675_v61 = vpop.f32.mrf.mxu0 }
  0xac   : > { %v769_v0 = vpop.f32.mrf.mxu1  ;;  %v676_v1 = vadd.f32 %v675_v61, %v2152_v60 }
  0xae   : > { %714 = vmatmul.bf16.gmra.mxu0 %v1650_v59  ;;  %1808 = vmatmul.msk.bf16.gmra.mxu3 %vm607_vm2, %v1662_v63  ;;  %v765_v4 = vadd.f32 %v764_v51, %v676_v1 }
  0xaf   : > { %892 = vmatmul.bf16.gmra.mxu2 %v1650_v59  ;;  %1792 = vmatmul.msk.bf16.gmra.mxu1 %vm607_vm2, %v1662_v63  ;;  %v1675_v63 = vld [vmem:[%s2049_s29 + $0xb8] sm:$0xf0] }
  0xb0   : > { %v1206_v10 = vmul.f32 %v765_v4, %v765_v4 }
  0xb1   : > { %v947_v7 = vpop.f32.mrf.mxu3 }
  0xb2   : > { %v853_v3 = vpop.f32.mrf.mxu2 }
  0xb3   : > { %v854_v5 = vadd.f32 %v853_v3, %v2155_v2  ;;  %v677_v6 = vpop.f32.mrf.mxu0 }
  0xb4   : > { %v678_v8 = vadd.f32 %v677_v6, %v2152_v60  ;;  %v771_v13 = vpop.f32.mrf.mxu1 }
  0xb5   : > { %v943_v9 = vadd.f32 %v942_v52, %v854_v5 }
  0xb6   : > { %v767_v12 = vadd.f32 %v766_v53, %v678_v8 }
  0xb7   : > { %v1022_v14 = vpack.c.bf16 %v943_v9, %v765_v4  ;;  %v1207_v29 = vmul.f32 %v943_v9, %v943_v9  ;;  %v1127_v33 = vsel %vm1126_vm6, %v943_v9, 0.0 }
  0xb8   : > { %v1089_v17 = vadd.f32 %v767_v12, %v765_v4  ;;  %v1208_v18 = vmul.f32 %v767_v12, %v767_v12  ;;  %v1666_v4 = vor.u32 %v1840_v56, %v1665_v55 }
  0xb9   : > { %1057 = vst.msk [vmem:[%s2166_s22] sm:$0xff] %vm2168_vm5, %v1022_v14  ;;  %v949_v26 = vpop.f32.mrf.mxu3  ;;  %v1307_v40 = vsel %vm1126_vm6, %v1207_v29, 0.0 }
  0xba   : > { %v1270_v21 = vadd.f32 %v1208_v18, %v1206_v10  ;;  %v855_v22 = vpop.f32.mrf.mxu2 }
  0xbb   : > { %v856_v24 = vadd.f32 %v855_v22, %v2155_v2  ;;  %v680_v25 = vpop.f32.mrf.mxu0 }
  0xbc   : > { %v681_v27 = vadd.f32 %v680_v25, %v2152_v60  ;;  %v774_v32 = vpop.f32.mrf.mxu1 }
  0xbd   : > { %v945_v30 = vadd.f32 %v944_v62, %v856_v24  ;;  %v1841_v62 = vld [vmem:[%s2049_s29 + $0xb4] sm:$0xf] }
  0xbe   : > { %v770_v31 = vadd.f32 %v769_v0, %v681_v27  ;;  %719 = vmatmul.bf16.gmra.mxu0 %v1658_v23  ;;  %1809 = vmatmul.msk.bf16.gmra.mxu3 %vm607_vm2, %v1670_v28  ;;  %v1678_v9 = vor.u32 %v1841_v62, %v1675_v63 }
  0xbf   : > { %v1023_v34 = vpack.c.bf16 %v945_v30, %v767_v12  ;;  %v1128_v35 = vsel %vm1126_vm6, %v945_v30, 0.0  ;;  %v1209_v36 = vmul.f32 %v945_v30, %v945_v30  ;;  %897 = vmatmul.bf16.gmra.mxu2 %v1658_v23  ;;  %1793 = vmatmul.msk.bf16.gmra.mxu1 %vm607_vm2, %v1670_v28 }
  0xc0   : > { %v1129_v37 = vadd.f32 %v1128_v35, %v1127_v33  ;;  %v1090_v38 = vadd.f32 %v1089_v17, %v770_v31  ;;  %v1210_v39 = vmul.f32 %v770_v31, %v770_v31  ;;  %v1842_v35 = vld [vmem:[%s2049_s29 + $0xb4] sm:$0xf0] }
  0xc1   : > { %1058 = vst.msk [vmem:[%s2166_s22 + $0x8] sm:$0xff] %vm2168_vm5, %v1023_v34  ;;  %v1308_v41 = vsel %vm1126_vm6, %v1209_v36, 0.0  ;;  %v952_v47 = vpop.f32.mrf.mxu3  ;;  %v1673_v34 = vld [vmem:[%s2049_s29 + $0xb0] sm:$0xf] }
  0xc2   : > { %v1309_v42 = vadd.f32 %v1308_v41, %v1307_v40  ;;  %v1271_v43 = vadd.f32 %v1270_v21, %v1210_v39  ;;  %v858_v44 = vpop.f32.mrf.mxu2  ;;  %v1843_v40 = vld [vmem:[%s2049_s29 + $0xc4] sm:$0xf]  ;;  %v1683_v41 = vld [vmem:[%s2049_s29 + $0xc8] sm:$0xf0] }
  0xc3   : > { %v859_v45 = vadd.f32 %v858_v44, %v2155_v2  ;;  %v682_v46 = vpop.f32.mrf.mxu0 }
  0xc4   : > { %v683_v48 = vadd.f32 %v682_v46, %v2152_v60  ;;  %v776_v51 = vpop.f32.mrf.mxu1 }
  0xc5   : > { %v948_v49 = vadd.f32 %v947_v7, %v859_v45  ;;  %v1674_v45 = vor.u32 %v1842_v35, %v1673_v34 }
  0xc6   : > { %v772_v50 = vadd.f32 %v771_v13, %v683_v48 }
  0xc7   : > { %v1024_v52 = vpack.c.bf16 %v948_v49, %v770_v31  ;;  %v1130_v53 = vsel %vm1126_vm6, %v948_v49, 0.0  ;;  %v1211_v54 = vmul.f32 %v948_v49, %v948_v49 }
  0xc8   : > { %v1131_v57 = vadd.f32 %v1130_v53, %v1129_v37  ;;  %v1091_v58 = vadd.f32 %v1090_v38, %v772_v50  ;;  %v1212_v59 = vmul.f32 %v772_v50, %v772_v50 }
  0xc9   : > { %1059 = vst.msk [vmem:[%s2166_s22 + $0x10] sm:$0xff] %vm2168_vm5, %v1024_v52  ;;  %v1310_v61 = vsel %vm1126_vm6, %v1211_v54, 0.0  ;;  %v954_v7 = vpop.f32.mrf.mxu3 }
  0xca   : > { %v1311_v0 = vadd.f32 %v1310_v61, %v1309_v42  ;;  %v1272_v1 = vadd.f32 %v1271_v43, %v1212_v59  ;;  %v860_v3 = vpop.f32.mrf.mxu2 }
  0xcb   : > { %v861_v5 = vadd.f32 %v860_v3, %v2155_v2  ;;  %v685_v6 = vpop.f32.mrf.mxu0 }
  0xcc   : > { %v686_v8 = vadd.f32 %v685_v6, %v2152_v60  ;;  %v779_v13 = vpop.f32.mrf.mxu1 }
  0xcd   : > { %v950_v10 = vadd.f32 %v949_v26, %v861_v5 }
  0xce   : > { %v775_v12 = vadd.f32 %v774_v32, %v686_v8  ;;  %724 = vmatmul.bf16.gmra.mxu0 %v1666_v4  ;;  %1810 = vmatmul.msk.bf16.gmra.mxu3 %vm607_vm2, %v1678_v9 }
  0xcf   : > { %v1025_v14 = vpack.c.bf16 %v950_v10, %v772_v50  ;;  %v1132_v15 = vsel %vm1126_vm6, %v950_v10, 0.0  ;;  %v1213_v16 = vmul.f32 %v950_v10, %v950_v10  ;;  %902 = vmatmul.bf16.gmra.mxu2 %v1666_v4  ;;  %1794 = vmatmul.msk.bf16.gmra.mxu1 %vm607_vm2, %v1678_v9  ;;  %v1686_v50 = vor.u32 %v1843_v40, %v1683_v41 }
  0xd0   : > { %v1133_v17 = vadd.f32 %v1132_v15, %v1131_v57  ;;  %v1092_v18 = vadd.f32 %v1091_v58, %v775_v12  ;;  %v1214_v19 = vmul.f32 %v775_v12, %v775_v12 }
  0xd1   : > { %1060 = vst.msk [vmem:[%s2166_s22 + $0x18] sm:$0xff] %vm2168_vm5, %v1025_v14  ;;  %v1312_v20 = vsel %vm1126_vm6, %v1213_v16, 0.0  ;;  %v957_v26 = vpop.f32.mrf.mxu3  ;;  %v1844_v14 = vld [vmem:[%s2049_s29 + $0xc4] sm:$0xf0] }
  0xd2   : > { %v1313_v21 = vadd.f32 %v1312_v20, %v1311_v0  ;;  %v1273_v22 = vadd.f32 %v1272_v1, %v1214_v19  ;;  %v863_v23 = vpop.f32.mrf.mxu2  ;;  %v1845_v19 = vld [vmem:[%s2049_s29 + $0xd4] sm:$0xf]  ;;  %v1691_v20 = vld [vmem:[%s2049_s29 + $0xd8] sm:$0xf0] }
  0xd3   : > { %v864_v24 = vadd.f32 %v863_v23, %v2155_v2  ;;  %v687_v25 = vpop.f32.mrf.mxu0 }
  0xd4   : > { %v688_v27 = vadd.f32 %v687_v25, %v2152_v60  ;;  %v781_v30 = vpop.f32.mrf.mxu1 }
  0xd5   : > { %v953_v28 = vadd.f32 %v952_v47, %v864_v24 }
  0xd6   : > { %v777_v29 = vadd.f32 %v776_v51, %v688_v27 }
  0xd7   : > { %v1026_v31 = vpack.c.bf16 %v953_v28, %v775_v12  ;;  %v1134_v32 = vsel %vm1126_vm6, %v953_v28, 0.0  ;;  %v1215_v33 = vmul.f32 %v953_v28, %v953_v28 }
  0xd8   : > { %v1135_v36 = vadd.f32 %v1134_v32, %v1133_v17  ;;  %v1093_v37 = vadd.f32 %v1092_v18, %v777_v29  ;;  %v1216_v38 = vmul.f32 %v777_v29, %v777_v29 }
  0xd9   : > { %1061 = vst.msk [vmem:[%s2166_s22 + $0x20] sm:$0xff] %vm2168_vm5, %v1026_v31  ;;  %v1314_v39 = vsel %vm1126_vm6, %v1215_v33, 0.0  ;;  %v959_v48 = vpop.f32.mrf.mxu3 }
  0xda   : > { %v1315_v42 = vadd.f32 %v1314_v39, %v1313_v21  ;;  %v1274_v43 = vadd.f32 %v1273_v22, %v1216_v38  ;;  %v865_v44 = vpop.f32.mrf.mxu2 }
  0xdb   : > { %v866_v46 = vadd.f32 %v865_v44, %v2155_v2  ;;  %v690_v47 = vpop.f32.mrf.mxu0 }
  0xdc   : > { %v691_v49 = vadd.f32 %v690_v47, %v2152_v60  ;;  %v784_v53 = vpop.f32.mrf.mxu1 }
  0xdd   : > { %v955_v51 = vadd.f32 %v954_v7, %v866_v46 }
  0xde   : > { %v780_v52 = vadd.f32 %v779_v13, %v691_v49  ;;  %729 = vmatmul.bf16.gmra.mxu0 %v1674_v45  ;;  %1811 = vmatmul.msk.bf16.gmra.mxu3 %vm607_vm2, %v1686_v50  ;;  %v1681_v13 = vld [vmem:[%s2049_s29 + $0xc0] sm:$0xf] }
  0xdf   : > { %v1027_v54 = vpack.c.bf16 %v955_v51, %v777_v29  ;;  %v1136_v55 = vsel %vm1126_vm6, %v955_v51, 0.0  ;;  %v1217_v56 = vmul.f32 %v955_v51, %v955_v51  ;;  %907 = vmatmul.bf16.gmra.mxu2 %v1674_v45  ;;  %1795 = vmatmul.msk.bf16.gmra.mxu1 %vm607_vm2, %v1686_v50  ;;  %v1682_v24 = vor.u32 %v1844_v14, %v1681_v13 }
  0xe0   : > { %v1137_v57 = vadd.f32 %v1136_v55, %v1135_v36  ;;  %v1094_v58 = vadd.f32 %v1093_v37, %v780_v52  ;;  %v1218_v59 = vmul.f32 %v780_v52, %v780_v52  ;;  %v1694_v29 = vor.u32 %v1845_v19, %v1691_v20 }
  0xe1   : > { %1062 = vst.msk [vmem:[%s2166_s22 + $0x28] sm:$0xff] %vm2168_vm5, %v1027_v54  ;;  %v1316_v61 = vsel %vm1126_vm6, %v1217_v56, 0.0  ;;  %v962_v4 = vpop.f32.mrf.mxu3  ;;  %v1846_v54 = vld [vmem:[%s2049_s29 + $0xd4] sm:$0xf0] }
  0xe2   : > { %v1317_v62 = vadd.f32 %v1316_v61, %v1315_v42  ;;  %v1275_v63 = vadd.f32 %v1274_v43, %v1218_v59  ;;  %v868_v0 = vpop.f32.mrf.mxu2  ;;  %v1847_v59 = vld [vmem:[%s2049_s29 + $0xe4] sm:$0xf]  ;;  %v1699_v61 = vld [vmem:[%s2049_s29 + $0xe8] sm:$0xf0] }
  0xe3   : > { %v869_v1 = vadd.f32 %v868_v0, %v2155_v2  ;;  %v692_v3 = vpop.f32.mrf.mxu0 }
  0xe4   : > { %v693_v5 = vadd.f32 %v692_v3, %v2152_v60  ;;  %v786_v8 = vpop.f32.mrf.mxu1 }
  0xe5   : > { %v958_v6 = vadd.f32 %v957_v26, %v869_v1 }
  0xe6   : > { %v782_v7 = vadd.f32 %v781_v30, %v693_v5 }
  0xe7   : > { %v1028_v9 = vpack.c.bf16 %v958_v6, %v780_v52  ;;  %v1138_v10 = vsel %vm1126_vm6, %v958_v6, 0.0  ;;  %v1219_v12 = vmul.f32 %v958_v6, %v958_v6 }
  0xe8   : > { %v1139_v15 = vadd.f32 %v1138_v10, %v1137_v57  ;;  %v1095_v16 = vadd.f32 %v1094_v58, %v782_v7  ;;  %v1220_v17 = vmul.f32 %v782_v7, %v782_v7 }
  0xe9   : > { %1063 = vst.msk [vmem:[%s2166_s22 + $0x30] sm:$0xff] %vm2168_vm5, %v1028_v9  ;;  %v1318_v18 = vsel %vm1126_vm6, %v1219_v12, 0.0  ;;  %v964_v27 = vpop.f32.mrf.mxu3 }
  0xea   : > { %v1319_v21 = vadd.f32 %v1318_v18, %v1317_v62  ;;  %v1276_v22 = vadd.f32 %v1275_v63, %v1220_v17  ;;  %v870_v23 = vpop.f32.mrf.mxu2 }
  0xeb   : > { %v871_v25 = vadd.f32 %v870_v23, %v2155_v2  ;;  %v695_v26 = vpop.f32.mrf.mxu0 }
  0xec   : > { %v696_v28 = vadd.f32 %v695_v26, %v2152_v60  ;;  %v789_v32 = vpop.f32.mrf.mxu1 }
  0xed   : > { %v960_v30 = vadd.f32 %v959_v48, %v871_v25 }
  0xee   : > { %v785_v31 = vadd.f32 %v784_v53, %v696_v28  ;;  %734 = vmatmul.bf16.gmra.mxu0 %v1682_v24  ;;  %1812 = vmatmul.msk.bf16.gmra.mxu3 %vm607_vm2, %v1694_v29  ;;  %v1689_v53 = vld [vmem:[%s2049_s29 + $0xd0] sm:$0xf] }
  0xef   : > { %v1029_v33 = vpack.c.bf16 %v960_v30, %v782_v7  ;;  %v1140_v34 = vsel %vm1126_vm6, %v960_v30, 0.0  ;;  %v1221_v35 = vmul.f32 %v960_v30, %v960_v30  ;;  %912 = vmatmul.bf16.gmra.mxu2 %v1682_v24  ;;  %1796 = vmatmul.msk.bf16.gmra.mxu1 %vm607_vm2, %v1694_v29  ;;  %v1690_v1 = vor.u32 %v1846_v54, %v1689_v53 }
  0xf0   : > { %v1141_v36 = vadd.f32 %v1140_v34, %v1139_v15  ;;  %v1096_v37 = vadd.f32 %v1095_v16, %v785_v31  ;;  %v1222_v38 = vmul.f32 %v785_v31, %v785_v31  ;;  %v1702_v7 = vor.u32 %v1847_v59, %v1699_v61 }
  0xf1   : > { %1064 = vst.msk [vmem:[%s2166_s22 + $0x38] sm:$0xff] %vm2168_vm5, %v1029_v33  ;;  %v1320_v39 = vsel %vm1126_vm6, %v1221_v35, 0.0  ;;  %v967_v45 = vpop.f32.mrf.mxu3  ;;  %v1848_v33 = vld [vmem:[%s2049_s29 + $0xe4] sm:$0xf0] }
  0xf2   : > { %v1321_v40 = vadd.f32 %v1320_v39, %v1319_v21  ;;  %v1277_v41 = vadd.f32 %v1276_v22, %v1222_v38  ;;  %v873_v42 = vpop.f32.mrf.mxu2  ;;  %v1849_v38 = vld [vmem:[%s2049_s29 + $0xf4] sm:$0xf]  ;;  %v1707_v39 = vld [vmem:[%s2049_s29 + $0xf8] sm:$0xf0] }
  0xf3   : > { %v874_v43 = vadd.f32 %v873_v42, %v2155_v2  ;;  %v697_v44 = vpop.f32.mrf.mxu0 }
  0xf4   : > { %v698_v46 = vadd.f32 %v697_v44, %v2152_v60  ;;  %v791_v49 = vpop.f32.mrf.mxu1 }
  0xf5   : > { %v963_v47 = vadd.f32 %v962_v4, %v874_v43 }
  0xf6   : > { %v787_v48 = vadd.f32 %v786_v8, %v698_v46 }
  0xf7   : > { %v1030_v50 = vpack.c.bf16 %v963_v47, %v785_v31  ;;  %v1142_v51 = vsel %vm1126_vm6, %v963_v47, 0.0  ;;  %v1223_v52 = vmul.f32 %v963_v47, %v963_v47 }
  0xf8   : > { %v1143_v55 = vadd.f32 %v1142_v51, %v1141_v36  ;;  %v1097_v56 = vadd.f32 %v1096_v37, %v787_v48  ;;  %v1224_v57 = vmul.f32 %v787_v48, %v787_v48 }
  0xf9   : > { %1065 = vst.msk [vmem:[%s2166_s22 + $0x40] sm:$0xff] %vm2168_vm5, %v1030_v50  ;;  %v1322_v58 = vsel %vm1126_vm6, %v1223_v52, 0.0  ;;  %v969_v5 = vpop.f32.mrf.mxu3 }
  0xfa   : > { %v1323_v62 = vadd.f32 %v1322_v58, %v1321_v40  ;;  %v1278_v63 = vadd.f32 %v1277_v41, %v1224_v57  ;;  %v875_v0 = vpop.f32.mrf.mxu2 }
  0xfb   : > { %v876_v3 = vadd.f32 %v875_v0, %v2155_v2  ;;  %v700_v4 = vpop.f32.mrf.mxu0 }
  0xfc   : > { %v701_v6 = vadd.f32 %v700_v4, %v2152_v60  ;;  %v794_v10 = vpop.f32.mrf.mxu1 }
  0xfd   : > { %v965_v8 = vadd.f32 %v964_v27, %v876_v3 }
  0xfe   : > { %v790_v9 = vadd.f32 %v789_v32, %v701_v6  ;;  %739 = vmatmul.bf16.gmra.mxu0 %v1690_v1  ;;  %1813 = vmatmul.msk.bf16.gmra.mxu3 %vm607_vm2, %v1702_v7  ;;  %v1697_v32 = vld [vmem:[%s2049_s29 + $0xe0] sm:$0xf] }
  0xff   : > { %v1031_v12 = vpack.c.bf16 %v965_v8, %v787_v48  ;;  %v1144_v13 = vsel %vm1126_vm6, %v965_v8, 0.0  ;;  %v1225_v14 = vmul.f32 %v965_v8, %v965_v8  ;;  %917 = vmatmul.bf16.gmra.mxu2 %v1690_v1  ;;  %1797 = vmatmul.msk.bf16.gmra.mxu1 %vm607_vm2, %v1702_v7  ;;  %v1698_v43 = vor.u32 %v1848_v33, %v1697_v32 }
 0x100   : > { %v1145_v15 = vadd.f32 %v1144_v13, %v1143_v55  ;;  %v1098_v16 = vadd.f32 %v1097_v56, %v790_v9  ;;  %v1226_v17 = vmul.f32 %v790_v9, %v790_v9  ;;  %v1710_v48 = vor.u32 %v1849_v38, %v1707_v39 }
 0x101   : > { %1066 = vst.msk [vmem:[%s2166_s22 + $0x48] sm:$0xff] %vm2168_vm5, %v1031_v12  ;;  %v1324_v18 = vsel %vm1126_vm6, %v1225_v14, 0.0  ;;  %v972_v24 = vpop.f32.mrf.mxu3  ;;  %v1850_v12 = vld [vmem:[%s2049_s29 + $0xf4] sm:$0xf0] }
 0x102   : > { %v1325_v19 = vadd.f32 %v1324_v18, %v1323_v62  ;;  %v1279_v20 = vadd.f32 %v1278_v63, %v1226_v17  ;;  %v878_v21 = vpop.f32.mrf.mxu2 }
 0x103   : > { %v879_v22 = vadd.f32 %v878_v21, %v2155_v2  ;;  %v702_v23 = vpop.f32.mrf.mxu0 }
 0x104   : > { %v703_v25 = vadd.f32 %v702_v23, %v2152_v60  ;;  %v796_v28 = vpop.f32.mrf.mxu1 }
 0x105   : > { %v968_v26 = vadd.f32 %v967_v45, %v879_v22 }
 0x106   : > { %v792_v27 = vadd.f32 %v791_v49, %v703_v25 }
 0x107   : > { %v1032_v29 = vpack.c.bf16 %v968_v26, %v790_v9  ;;  %v1146_v30 = vsel %vm1126_vm6, %v968_v26, 0.0  ;;  %v1227_v31 = vmul.f32 %v968_v26, %v968_v26 }
 0x108   : > { %v1147_v34 = vadd.f32 %v1146_v30, %v1145_v15  ;;  %v1099_v35 = vadd.f32 %v1098_v16, %v792_v27  ;;  %v1228_v36 = vmul.f32 %v792_v27, %v792_v27 }
 0x109   : > { %1067 = vst.msk [vmem:[%s2166_s22 + $0x50] sm:$0xff] %vm2168_vm5, %v1032_v29  ;;  %v1326_v37 = vsel %vm1126_vm6, %v1227_v31, 0.0  ;;  %v974_v46 = vpop.f32.mrf.mxu3 }
 0x10a   : > { %v1327_v40 = vadd.f32 %v1326_v37, %v1325_v19  ;;  %v1280_v41 = vadd.f32 %v1279_v20, %v1228_v36  ;;  %v880_v42 = vpop.f32.mrf.mxu2 }
 0x10b   : > { %v881_v44 = vadd.f32 %v880_v42, %v2155_v2  ;;  %v705_v45 = vpop.f32.mrf.mxu0 }
 0x10c   : > { %v706_v47 = vadd.f32 %v705_v45, %v2152_v60  ;;  %v799_v51 = vpop.f32.mrf.mxu1 }
 0x10d   : > { %v970_v49 = vadd.f32 %v969_v5, %v881_v44 }
 0x10e   : > { %v795_v50 = vadd.f32 %v794_v10, %v706_v47  ;;  %744 = vmatmul.bf16.gmra.mxu0 %v1698_v43  ;;  %1814 = vmatmul.msk.bf16.gmra.mxu3 %vm607_vm2, %v1710_v48  ;;  %v1705_v10 = vld [vmem:[%s2049_s29 + $0xf0] sm:$0xf] }
 0x10f   : > { %v1033_v52 = vpack.c.bf16 %v970_v49, %v792_v27  ;;  %v1148_v53 = vsel %vm1126_vm6, %v970_v49, 0.0  ;;  %v1229_v54 = vmul.f32 %v970_v49, %v970_v49  ;;  %922 = vmatmul.bf16.gmra.mxu2 %v1698_v43  ;;  %1798 = vmatmul.msk.bf16.gmra.mxu1 %vm607_vm2, %v1710_v48  ;;  %v1706_v20 = vor.u32 %v1850_v12, %v1705_v10 }
 0x110   : > { %v1149_v55 = vadd.f32 %v1148_v53, %v1147_v34  ;;  %v1100_v56 = vadd.f32 %v1099_v35, %v795_v50  ;;  %v1230_v57 = vmul.f32 %v795_v50, %v795_v50 }
 0x111   : > { %1068 = vst.msk [vmem:[%s2166_s22 + $0x58] sm:$0xff] %vm2168_vm5, %v1033_v52  ;;  %v1328_v58 = vsel %vm1126_vm6, %v1229_v54, 0.0  ;;  %v977_v1 = vpop.f32.mrf.mxu3 }
 0x112   : > { %v1329_v59 = vadd.f32 %v1328_v58, %v1327_v40  ;;  %v1281_v61 = vadd.f32 %v1280_v41, %v1230_v57  ;;  %v883_v62 = vpop.f32.mrf.mxu2 }
 0x113   : > { %v884_v63 = vadd.f32 %v883_v62, %v2155_v2  ;;  %v707_v0 = vpop.f32.mrf.mxu0 }
 0x114   : > { %v708_v3 = vadd.f32 %v707_v0, %v2152_v60  ;;  %v801_v6 = vpop.f32.mrf.mxu1 }
 0x115   : > { %v973_v4 = vadd.f32 %v972_v24, %v884_v63 }
 0x116   : > { %v797_v5 = vadd.f32 %v796_v28, %v708_v3 }
 0x117   : > { %v1034_v7 = vpack.c.bf16 %v973_v4, %v795_v50  ;;  %v1150_v8 = vsel %vm1126_vm6, %v973_v4, 0.0  ;;  %v1231_v9 = vmul.f32 %v973_v4, %v973_v4 }
 0x118   : > { %v1151_v13 = vadd.f32 %v1150_v8, %v1149_v55  ;;  %v1101_v14 = vadd.f32 %v1100_v56, %v797_v5  ;;  %v1232_v15 = vmul.f32 %v797_v5, %v797_v5 }
 0x119   : > { %1069 = vst.msk [vmem:[%s2166_s22 + $0x60] sm:$0xff] %vm2168_vm5, %v1034_v7  ;;  %v1330_v16 = vsel %vm1126_vm6, %v1231_v9, 0.0  ;;  %v979_v23 = vpop.f32.mrf.mxu3 }
 0x11a   : > { %v1331_v17 = vadd.f32 %v1330_v16, %v1329_v59  ;;  %v1282_v18 = vadd.f32 %v1281_v61, %v1232_v15  ;;  %v885_v19 = vpop.f32.mrf.mxu2 }
 0x11b   : > { %v886_v21 = vadd.f32 %v885_v19, %v2155_v2  ;;  %v710_v22 = vpop.f32.mrf.mxu0 }
 0x11c   : > { %v711_v24 = vadd.f32 %v710_v22, %v2152_v60  ;;  %v804_v27 = vpop.f32.mrf.mxu1 }
 0x11d   : > { %v975_v25 = vadd.f32 %v974_v46, %v886_v21 }
 0x11e   : > { %v800_v26 = vadd.f32 %v799_v51, %v711_v24  ;;  %749 = vmatmul.bf16.gmra.mxu0 %v1706_v20 }
 0x11f   : > { %v1035_v28 = vpack.c.bf16 %v975_v25, %v797_v5  ;;  %v1152_v29 = vsel %vm1126_vm6, %v975_v25, 0.0  ;;  %v1233_v30 = vmul.f32 %v975_v25, %v975_v25  ;;  %927 = vmatmul.bf16.gmra.mxu2 %v1706_v20 }
 0x120   : > { %v1153_v31 = vadd.f32 %v1152_v29, %v1151_v13  ;;  %v1102_v32 = vadd.f32 %v1101_v14, %v800_v26  ;;  %v1234_v33 = vmul.f32 %v800_v26, %v800_v26 }
 0x121   : > { %1070 = vst.msk [vmem:[%s2166_s22 + $0x68] sm:$0xff] %vm2168_vm5, %v1035_v28  ;;  %v1332_v34 = vsel %vm1126_vm6, %v1233_v30, 0.0  ;;  %v982_v40 = vpop.f32.mrf.mxu3 }
 0x122   : > { %v1333_v35 = vadd.f32 %v1332_v34, %v1331_v17  ;;  %v1283_v36 = vadd.f32 %v1282_v18, %v1234_v33  ;;  %v888_v37 = vpop.f32.mrf.mxu2 }
 0x123   : > { %v889_v38 = vadd.f32 %v888_v37, %v2155_v2  ;;  %v712_v39 = vpop.f32.mrf.mxu0 }
 0x124   : > { %v713_v41 = vadd.f32 %v712_v39, %v2152_v60  ;;  %v806_v44 = vpop.f32.mrf.mxu1 }
 0x125   : > { %v978_v42 = vadd.f32 %v977_v1, %v889_v38 }
 0x126   : > { %v802_v43 = vadd.f32 %v801_v6, %v713_v41 }
 0x127   : > { %v1036_v45 = vpack.c.bf16 %v978_v42, %v800_v26  ;;  %v1154_v46 = vsel %vm1126_vm6, %v978_v42, 0.0  ;;  %v1235_v47 = vmul.f32 %v978_v42, %v978_v42 }
 0x128   : > { %v1155_v48 = vadd.f32 %v1154_v46, %v1153_v31  ;;  %v1103_v49 = vadd.f32 %v1102_v32, %v802_v43  ;;  %v1236_v50 = vmul.f32 %v802_v43, %v802_v43 }
 0x129   : > { %1071 = vst.msk [vmem:[%s2166_s22 + $0x70] sm:$0xff] %vm2168_vm5, %v1036_v45  ;;  %v1334_v51 = vsel %vm1126_vm6, %v1235_v47, 0.0  ;;  %v984_v57 = vpop.f32.mrf.mxu3 }
 0x12a   : > { %v1335_v52 = vadd.f32 %v1334_v51, %v1333_v35  ;;  %v1284_v53 = vadd.f32 %v1283_v36, %v1236_v50  ;;  %v890_v54 = vpop.f32.mrf.mxu2 }
 0x12b   : > { %v891_v55 = vadd.f32 %v890_v54, %v2155_v2  ;;  %v715_v56 = vpop.f32.mrf.mxu0 }
 0x12c   : > { %v716_v58 = vadd.f32 %v715_v56, %v2152_v60  ;;  %v809_v62 = vpop.f32.mrf.mxu1 }
 0x12d   : > { %v980_v59 = vadd.f32 %v979_v23, %v891_v55 }
 0x12e   : > { %v805_v61 = vadd.f32 %v804_v27, %v716_v58 }
 0x12f   : > { %v1037_v63 = vpack.c.bf16 %v980_v59, %v802_v43  ;;  %v1156_v0 = vsel %vm1126_vm6, %v980_v59, 0.0  ;;  %v1237_v1 = vmul.f32 %v980_v59, %v980_v59 }
 0x130   : > { %v1157_v3 = vadd.f32 %v1156_v0, %v1155_v48  ;;  %v1104_v4 = vadd.f32 %v1103_v49, %v805_v61  ;;  %v1238_v5 = vmul.f32 %v805_v61, %v805_v61 }
 0x131   : > { %1072 = vst.msk [vmem:[%s2166_s22 + $0x78] sm:$0xff] %vm2168_vm5, %v1037_v63  ;;  %v1336_v6 = vsel %vm1126_vm6, %v1237_v1, 0.0  ;;  %v987_v13 = vpop.f32.mrf.mxu3 }
 0x132   : > { %v1337_v7 = vadd.f32 %v1336_v6, %v1335_v52  ;;  %v1285_v8 = vadd.f32 %v1284_v53, %v1238_v5  ;;  %v893_v9 = vpop.f32.mrf.mxu2 }
 0x133   : > { %v894_v10 = vadd.f32 %v893_v9, %v2155_v2  ;;  %v717_v12 = vpop.f32.mrf.mxu0 }
 0x134   : > { %v718_v14 = vadd.f32 %v717_v12, %v2152_v60  ;;  %v811_v17 = vpop.f32.mrf.mxu1 }
 0x135   : > { %v983_v15 = vadd.f32 %v982_v40, %v894_v10 }
 0x136   : > { %v807_v16 = vadd.f32 %v806_v44, %v718_v14 }
 0x137   : > { %v1038_v18 = vpack.c.bf16 %v983_v15, %v805_v61  ;;  %v1158_v19 = vsel %vm1126_vm6, %v983_v15, 0.0  ;;  %v1239_v20 = vmul.f32 %v983_v15, %v983_v15 }
 0x138   : > { %v1159_v21 = vadd.f32 %v1158_v19, %v1157_v3  ;;  %v1105_v22 = vadd.f32 %v1104_v4, %v807_v16  ;;  %v1240_v23 = vmul.f32 %v807_v16, %v807_v16 }
 0x139   : > { %1073 = vst.msk [vmem:[%s2166_s22 + $0x80] sm:$0xff] %vm2168_vm5, %v1038_v18  ;;  %v1338_v24 = vsel %vm1126_vm6, %v1239_v20, 0.0  ;;  %v989_v30 = vpop.f32.mrf.mxu3 }
 0x13a   : > { %v1339_v25 = vadd.f32 %v1338_v24, %v1337_v7  ;;  %v1286_v26 = vadd.f32 %v1285_v8, %v1240_v23  ;;  %v895_v27 = vpop.f32.mrf.mxu2 }
 0x13b   : > { %v896_v28 = vadd.f32 %v895_v27, %v2155_v2  ;;  %v720_v29 = vpop.f32.mrf.mxu0 }
 0x13c   : > { %v721_v31 = vadd.f32 %v720_v29, %v2152_v60  ;;  %v814_v34 = vpop.f32.mrf.mxu1 }
 0x13d   : > { %v985_v32 = vadd.f32 %v984_v57, %v896_v28 }
 0x13e   : > { %v810_v33 = vadd.f32 %v809_v62, %v721_v31 }
 0x13f   : > { %v1039_v35 = vpack.c.bf16 %v985_v32, %v807_v16  ;;  %v1160_v36 = vsel %vm1126_vm6, %v985_v32, 0.0  ;;  %v1241_v37 = vmul.f32 %v985_v32, %v985_v32 }
 0x140   : > { %v1161_v38 = vadd.f32 %v1160_v36, %v1159_v21  ;;  %v1106_v39 = vadd.f32 %v1105_v22, %v810_v33  ;;  %v1242_v40 = vmul.f32 %v810_v33, %v810_v33 }
 0x141   : > { %1074 = vst.msk [vmem:[%s2166_s22 + $0x88] sm:$0xff] %vm2168_vm5, %v1039_v35  ;;  %v1340_v41 = vsel %vm1126_vm6, %v1241_v37, 0.0  ;;  %v992_v47 = vpop.f32.mrf.mxu3 }
 0x142   : > { %v1341_v42 = vadd.f32 %v1340_v41, %v1339_v25  ;;  %v1287_v43 = vadd.f32 %v1286_v26, %v1242_v40  ;;  %v898_v44 = vpop.f32.mrf.mxu2 }
 0x143   : > { %v899_v45 = vadd.f32 %v898_v44, %v2155_v2  ;;  %v722_v46 = vpop.f32.mrf.mxu0 }
 0x144   : > { %v723_v48 = vadd.f32 %v722_v46, %v2152_v60  ;;  %v816_v51 = vpop.f32.mrf.mxu1 }
 0x145   : > { %v988_v49 = vadd.f32 %v987_v13, %v899_v45 }
 0x146   : > { %v812_v50 = vadd.f32 %v811_v17, %v723_v48 }
 0x147   : > { %v1040_v52 = vpack.c.bf16 %v988_v49, %v810_v33  ;;  %v1162_v53 = vsel %vm1126_vm6, %v988_v49, 0.0  ;;  %v1243_v54 = vmul.f32 %v988_v49, %v988_v49 }
 0x148   : > { %v1163_v55 = vadd.f32 %v1162_v53, %v1161_v38  ;;  %v1107_v56 = vadd.f32 %v1106_v39, %v812_v50  ;;  %v1244_v57 = vmul.f32 %v812_v50, %v812_v50 }
 0x149   : > { %1075 = vst.msk [vmem:[%s2166_s22 + $0x90] sm:$0xff] %vm2168_vm5, %v1040_v52  ;;  %v1342_v58 = vsel %vm1126_vm6, %v1243_v54, 0.0  ;;  %v994_v1 = vpop.f32.mrf.mxu3 }
 0x14a   : > { %v1343_v59 = vadd.f32 %v1342_v58, %v1341_v42  ;;  %v1288_v61 = vadd.f32 %v1287_v43, %v1244_v57  ;;  %v900_v62 = vpop.f32.mrf.mxu2 }
 0x14b   : > { %v901_v63 = vadd.f32 %v900_v62, %v2155_v2  ;;  %v725_v0 = vpop.f32.mrf.mxu0 }
 0x14c   : > { %v726_v3 = vadd.f32 %v725_v0, %v2152_v60  ;;  %v819_v6 = vpop.f32.mrf.mxu1 }
 0x14d   : > { %v990_v4 = vadd.f32 %v989_v30, %v901_v63 }
 0x14e   : > { %v815_v5 = vadd.f32 %v814_v34, %v726_v3 }
 0x14f   : > { %v1041_v7 = vpack.c.bf16 %v990_v4, %v812_v50  ;;  %v1164_v8 = vsel %vm1126_vm6, %v990_v4, 0.0  ;;  %v1245_v9 = vmul.f32 %v990_v4, %v990_v4 }
 0x150   : > { %v1165_v10 = vadd.f32 %v1164_v8, %v1163_v55  ;;  %v1108_v12 = vadd.f32 %v1107_v56, %v815_v5  ;;  %v1246_v13 = vmul.f32 %v815_v5, %v815_v5 }
 0x151   : > { %1076 = vst.msk [vmem:[%s2166_s22 + $0x98] sm:$0xff] %vm2168_vm5, %v1041_v7  ;;  %v1344_v14 = vsel %vm1126_vm6, %v1245_v9, 0.0  ;;  %v997_v20 = vpop.f32.mrf.mxu3 }
 0x152   : > { %v1345_v15 = vadd.f32 %v1344_v14, %v1343_v59  ;;  %v1289_v16 = vadd.f32 %v1288_v61, %v1246_v13  ;;  %v903_v17 = vpop.f32.mrf.mxu2 }
 0x153   : > { %v904_v18 = vadd.f32 %v903_v17, %v2155_v2  ;;  %v727_v19 = vpop.f32.mrf.mxu0 }
 0x154   : > { %v728_v21 = vadd.f32 %v727_v19, %v2152_v60  ;;  %v821_v24 = vpop.f32.mrf.mxu1 }
 0x155   : > { %v993_v22 = vadd.f32 %v992_v47, %v904_v18 }
 0x156   : > { %v817_v23 = vadd.f32 %v816_v51, %v728_v21 }
 0x157   : > { %v1042_v25 = vpack.c.bf16 %v993_v22, %v815_v5  ;;  %v1166_v26 = vsel %vm1126_vm6, %v993_v22, 0.0  ;;  %v1247_v27 = vmul.f32 %v993_v22, %v993_v22 }
 0x158   : > { %v2351_v28 = vadd.f32 %v1166_v26, %v1165_v10  ;;  %v2353_v29 = vadd.f32 %v1108_v12, %v817_v23  ;;  %v1248_v30 = vmul.f32 %v817_v23, %v817_v23 }
 0x159   : > { %1077 = vst.msk [vmem:[%s2166_s22 + $0xa0] sm:$0xff] %vm2168_vm5, %v1042_v25  ;;  %v1346_v31 = vsel %vm1126_vm6, %v1247_v27, 0.0  ;;  %v999_v37 = vpop.f32.mrf.mxu3 }
 0x15a   : > { %v2359_v32 = vadd.f32 %v1346_v31, %v1345_v15  ;;  %v2361_v33 = vadd.f32 %v1289_v16, %v1248_v30  ;;  %v905_v34 = vpop.f32.mrf.mxu2 }
 0x15b   : > { %v906_v35 = vadd.f32 %v905_v34, %v2155_v2  ;;  %v730_v36 = vpop.f32.mrf.mxu0 }
 0x15c   : > { %v824_v39 = vpop.f32.mrf.mxu1  ;;  %v731_v41 = vadd.f32 %v730_v36, %v2152_v60 }
 0x15d   : > { %v2364_v38 = vadd.f32 %v994_v1, %v906_v35 }
 0x15e   : > { %v2372_v45 = vadd.f32 %v819_v6, %v731_v41 }
 0x15f   : > { %v1043_v40 = vpack.c.bf16 %v2364_v38, %v817_v23  ;;  %v1249_v36 = vmul.f32 %v2364_v38, %v2364_v38 }
 0x160   : > { %v1250_v41 = vmul.f32 %v2372_v45, %v2372_v45 }
 0x161   : > { %1078 = vst.msk [vmem:[%s2166_s22 + $0xa8] sm:$0xff] %vm2168_vm5, %v1043_v40  ;;  %v1002_v47 = vpop.f32.mrf.mxu3  ;;  %v1168_v40 = vsel %vm1126_vm6, %v2364_v38, 0.0 }
 0x162   : > { %v908_v42 = vpop.f32.mrf.mxu2  ;;  %v1169_v38 = vadd.f32 %v1168_v40, %v2351_v28 }
 0x163   : > { %v909_v43 = vadd.f32 %v908_v42, %v2155_v2  ;;  %v732_v44 = vpop.f32.mrf.mxu0 }
 0x164   : > { %v826_v49 = vpop.f32.mrf.mxu1  ;;  %v733_v50 = vadd.f32 %v732_v44, %v2152_v60 }
 0x165   : > { %v2374_v46 = vadd.f32 %v997_v20, %v909_v43 }
 0x166   : > { %v2383_v54 = vadd.f32 %v821_v24, %v733_v50 }
 0x167   : > { %v1044_v48 = vpack.c.bf16 %v2374_v46, %v2372_v45  ;;  %v1251_v42 = vmul.f32 %v2374_v46, %v2374_v46 }
 0x169   : > { %1079 = vst.msk [vmem:[%s2166_s22 + $0xb0] sm:$0xff] %vm2168_vm5, %v1044_v48  ;;  %v1004_v57 = vpop.f32.mrf.mxu3  ;;  %v1252_v48 = vmul.f32 %v2383_v54, %v2383_v54 }
 0x16a   : > { %v910_v51 = vpop.f32.mrf.mxu2 }
 0x16b   : > { %v911_v52 = vadd.f32 %v910_v51, %v2155_v2  ;;  %v735_v53 = vpop.f32.mrf.mxu0  ;;  %v1110_v51 = vadd.f32 %v2353_v29, %v2372_v45 }
 0x16c   : > { %v736_v58 = vadd.f32 %v735_v53, %v2152_v60  ;;  %v829_v59 = vpop.f32.mrf.mxu1 }
 0x16d   : > { %v2385_v55 = vadd.f32 %v999_v37, %v911_v52  ;;  %v1170_v52 = vsel %vm1126_vm6, %v2374_v46, 0.0 }
 0x16e   : > { %v2394_v0 = vadd.f32 %v824_v39, %v736_v58  ;;  %v1171_v46 = vadd.f32 %v1170_v52, %v1169_v38 }
 0x16f   : > { %v1045_v56 = vpack.c.bf16 %v2385_v55, %v2383_v54  ;;  %v1253_v53 = vmul.f32 %v2385_v55, %v2385_v55  ;;  %v1172_v29 = vsel %vm1126_vm6, %v2385_v55, 0.0 }
 0x170   : > { %v1254_v58 = vmul.f32 %v2394_v0, %v2394_v0 }
 0x171   : > { %1080 = vst.msk [vmem:[%s2166_s22 + $0xb8] sm:$0xff] %vm2168_vm5, %v1045_v56  ;;  %v1007_v6 = vpop.f32.mrf.mxu3  ;;  %v1291_v56 = vadd.f32 %v2361_v33, %v1250_v41 }
 0x172   : > { %v913_v61 = vpop.f32.mrf.mxu2 }
 0x173   : > { %v914_v62 = vadd.f32 %v913_v61, %v2155_v2  ;;  %v737_v63 = vpop.f32.mrf.mxu0  ;;  %v1111_v61 = vadd.f32 %v1110_v51, %v2383_v54 }
 0x174   : > { %v738_v4 = vadd.f32 %v737_v63, %v2152_v60  ;;  %v831_v9 = vpop.f32.mrf.mxu1 }
 0x175   : > { %v2396_v1 = vadd.f32 %v1002_v47, %v914_v62  ;;  %v1348_v47 = vsel %vm1126_vm6, %v1249_v36, 0.0  ;;  %v1292_v62 = vadd.f32 %v1291_v56, %v1252_v48  ;;  %v1112_v54 = vadd.f32 %v1111_v61, %v2394_v0 }
 0x176   : > { %v2405_v10 = vadd.f32 %v826_v49, %v738_v4  ;;  %v1349_v28 = vadd.f32 %v1348_v47, %v2359_v32  ;;  %v1352_v32 = vsel %vm1126_vm6, %v1253_v53, 0.0 }
 0x177   : > { %v1046_v3 = vpack.c.bf16 %v2396_v1, %v2394_v0  ;;  %v1255_v33 = vmul.f32 %v2396_v1, %v2396_v1 }
 0x178   : > { %v1256_v55 = vmul.f32 %v2405_v10, %v2405_v10 }
 0x179   : > { %1081 = vst.msk [vmem:[%s2166_s22 + $0xc0] sm:$0xff] %vm2168_vm5, %v1046_v3  ;;  %v1009_v18 = vpop.f32.mrf.mxu3 }
 0x17a   : > { %v915_v5 = vpop.f32.mrf.mxu2 }
 0x17b   : > { %v916_v7 = vadd.f32 %v915_v5, %v2155_v2  ;;  %v740_v8 = vpop.f32.mrf.mxu0 }
 0x17c   : > { %v741_v14 = vadd.f32 %v740_v8, %v2152_v60  ;;  %v834_v21 = vpop.f32.mrf.mxu1 }
 0x17d   : > { %v2407_v12 = vadd.f32 %v1004_v57, %v916_v7  ;;  %v1350_v57 = vsel %vm1126_vm6, %v1251_v42, 0.0  ;;  %v1293_v7 = vadd.f32 %v1292_v62, %v1254_v58 }
 0x17e   : > { %v2416_v19 = vadd.f32 %v829_v59, %v741_v14  ;;  %v1351_v4 = vadd.f32 %v1350_v57, %v1349_v28  ;;  %v1174_v14 = vsel %vm1126_vm6, %v2396_v1, 0.0 }
 0x17f   : > { %v1047_v13 = vpack.c.bf16 %v2407_v12, %v2405_v10  ;;  %v1257_v8 = vmul.f32 %v2407_v12, %v2407_v12 }
 0x180   : > { %v1258_v0 = vmul.f32 %v2416_v19, %v2416_v19 }
 0x181   : > { %1082 = vst.msk [vmem:[%s2166_s22 + $0xc8] sm:$0xff] %vm2168_vm5, %v1047_v13  ;;  %v1012_v31 = vpop.f32.mrf.mxu3 }
 0x182   : > { %v918_v15 = vpop.f32.mrf.mxu2 }
 0x183   : > { %v919_v16 = vadd.f32 %v918_v15, %v2155_v2  ;;  %v742_v17 = vpop.f32.mrf.mxu0  ;;  %v1113_v15 = vadd.f32 %v1112_v54, %v2405_v10 }
 0x184   : > { %v743_v23 = vadd.f32 %v742_v17, %v2152_v60  ;;  %v836_v35 = vpop.f32.mrf.mxu1  ;;  %v1353_v17 = vadd.f32 %v1352_v32, %v1351_v4 }
 0x185   : > { %v2418_v20 = vadd.f32 %v1007_v6, %v919_v16  ;;  %v1173_v6 = vadd.f32 %v1172_v29, %v1171_v46 }
 0x186   : > { %v2427_v27 = vadd.f32 %v831_v9, %v743_v23  ;;  %v1294_v23 = vadd.f32 %v1293_v7, %v1256_v55 }
 0x187   : > { %v1048_v22 = vpack.c.bf16 %v2418_v20, %v2416_v19  ;;  %v1175_v10 = vadd.f32 %v1174_v14, %v1173_v6 }
 0x188   : > { %v1260_v1 = vmul.f32 %v2427_v27, %v2427_v27  ;;  %v1295_v36 = vadd.f32 %v1294_v23, %v1258_v0 }
 0x189   : > { %1083 = vst.msk [vmem:[%s2166_s22 + $0xd0] sm:$0xff] %vm2168_vm5, %v1048_v22  ;;  %v1014_v45 = vpop.f32.mrf.mxu3 }
 0x18a   : > { %v920_v24 = vpop.f32.mrf.mxu2 }
 0x18b   : > { %v921_v25 = vadd.f32 %v920_v24, %v2155_v2  ;;  %v745_v26 = vpop.f32.mrf.mxu0  ;;  %v1176_v24 = vsel %vm1126_vm6, %v2407_v12, 0.0  ;;  %v1178_v12 = vsel %vm1126_vm6, %v2418_v20, 0.0 }
 0x18c   : > { %v746_v37 = vadd.f32 %v745_v26, %v2152_v60  ;;  %v839_v3 = vpop.f32.mrf.mxu1  ;;  %v1356_v26 = vsel %vm1126_vm6, %v1257_v8, 0.0  ;;  %v1177_v41 = vadd.f32 %v1176_v24, %v1175_v10 }
 0x18d   : > { %v2429_v30 = vadd.f32 %v1009_v18, %v921_v25  ;;  %v1354_v18 = vsel %vm1126_vm6, %v1255_v33, 0.0  ;;  %v1114_v25 = vadd.f32 %v1113_v15, %v2416_v19  ;;  %v1296_v19 = vadd.f32 %v1295_v36, %v1260_v1 }
 0x18e   : > { %v835_v49 = vadd.f32 %v834_v21, %v746_v37  ;;  %v1355_v40 = vadd.f32 %v1354_v18, %v1353_v17 }
 0x18f   : > { %v1049_v34 = vpack.c.bf16 %v2429_v30, %v2427_v27 }
 0x190   : > { %v1262_v37 = vmul.f32 %v835_v49, %v835_v49  ;;  %v1357_v48 = vadd.f32 %v1356_v26, %v1355_v40 }
 0x191   : > { %1084 = vst.msk [vmem:[%s2166_s22 + $0xd8] sm:$0xff] %vm2168_vm5, %v1049_v34 }
 0x192   : > { %v923_v39 = vpop.f32.mrf.mxu2  ;;  %v1297_v56 = vadd.f32 %v1296_v19, %v1262_v37 }
 0x193   : > { %v924_v43 = vadd.f32 %v923_v39, %v2155_v2  ;;  %v747_v44 = vpop.f32.mrf.mxu0 }
 0x194   : > { %v748_v63 = vadd.f32 %v747_v44, %v2152_v60  ;;  %v1017_v44 = vpop.f32.mrf.mxu3  ;;  %v841_v53 = vpop.f32.mrf.mxu1 }
 0x195   : > { %v2449_v50 = vadd.f32 %v1012_v31, %v924_v43  ;;  %v1259_v31 = vmul.f32 %v2418_v20, %v2418_v20 }
 0x196   : > { %v837_v21 = vadd.f32 %v836_v35, %v748_v63  ;;  %v1115_v35 = vadd.f32 %v1114_v25, %v2427_v27  ;;  %v1261_v27 = vmul.f32 %v2429_v30, %v2429_v30 }
 0x197   : > { %v1050_v59 = vpack.c.bf16 %v2449_v50, %v835_v49  ;;  %v1358_v38 = vsel %vm1126_vm6, %v1259_v31, 0.0  ;;  %v1263_v28 = vmul.f32 %v2449_v50, %v2449_v50  ;;  %v1182_v63 = vsel %vm1126_vm6, %v2449_v50, 0.0 }
 0x198   : > { %v1116_v42 = vadd.f32 %v1115_v35, %v835_v49  ;;  %v1264_v43 = vmul.f32 %v837_v21, %v837_v21  ;;  %v1180_v49 = vsel %vm1126_vm6, %v2429_v30, 0.0  ;;  %v1359_v29 = vadd.f32 %v1358_v38, %v1357_v48 }
 0x199   : > { %1085 = vst.msk [vmem:[%s2166_s22 + $0xe0] sm:$0xff] %vm2168_vm5, %v1050_v59  ;;  %v1179_v59 = vadd.f32 %v1178_v12, %v1177_v41  ;;  %v1360_v33 = vsel %vm1126_vm6, %v1261_v27, 0.0  ;;  %v1362_v55 = vsel %vm1126_vm6, %v1263_v28, 0.0 }
 0x19a   : > { %v925_v5 = vpop.f32.mrf.mxu2  ;;  %v1117_v57 = vadd.f32 %v1116_v42, %v837_v21  ;;  %v1361_v7 = vadd.f32 %v1360_v33, %v1359_v29 }
 0x19b   : > { %v926_v9 = vadd.f32 %v925_v5, %v2155_v2  ;;  %v750_v13 = vpop.f32.mrf.mxu0  ;;  %v1181_v4 = vadd.f32 %v1180_v49, %v1179_v59 }
 0x19c   : > { %v751_v16 = vadd.f32 %v750_v13, %v2152_v60  ;;  %v1019_v18 = vpop.f32.mrf.mxu3 }
 0x19d   : > { %v1015_v22 = vadd.f32 %v1014_v45, %v926_v9  ;;  %v1298_v45 = vadd.f32 %v1297_v56, %v1264_v43  ;;  %v1183_v8 = vadd.f32 %v1182_v63, %v1181_v4 }
 0x19e   : > { %v840_v39 = vadd.f32 %v839_v3, %v751_v16  ;;  %v1363_v16 = vadd.f32 %v1362_v55, %v1361_v7 }
 0x19f   : > { %v1051_v34 = vpack.c.bf16 %v1015_v22, %v837_v21  ;;  %v1265_v3 = vmul.f32 %v1015_v22, %v1015_v22  ;;  %v1184_v5 = vsel %vm1126_vm6, %v1015_v22, 0.0 }
 0x1a0   : > { %v1266_v58 = vmul.f32 %v840_v39, %v840_v39  ;;  %v1118_v46 = vadd.f32 %v1117_v57, %v840_v39  ;;  %v1185_v17 = vadd.f32 %v1184_v5, %v1183_v8 }
 0x1a1   : > { %1086 = vst.msk [vmem:[%s2166_s22 + $0xe8] sm:$0xff] %vm2168_vm5, %v1051_v34  ;;  %v1364_v50 = vsel %vm1126_vm6, %v1265_v3, 0.0 }
 0x1a2   : > { %v928_v47 = vpop.f32.mrf.mxu2  ;;  %v1299_v32 = vadd.f32 %v1298_v45, %v1266_v58  ;;  %v1365_v24 = vadd.f32 %v1364_v50, %v1363_v16 }
 0x1a3   : > { %v929_v51 = vadd.f32 %v928_v47, %v2155_v2  ;;  %v752_v52 = vpop.f32.mrf.mxu0 }
 0x1a4   : > { %v753_v20 = vadd.f32 %v752_v52, %v2152_v60  ;;  %v1201_v52 = vlaneseq }
 0x1a5   : > { %v1018_v61 = vadd.f32 %v1017_v44, %v929_v51 }
 0x1a6   : > { %v842_v62 = vadd.f32 %v841_v53, %v753_v20  ;;  %vm1203_vm7 = vcmp.lt.s32.totalorder %v1201_v52, 192 }
 0x1a7   : > { %v1052_v60 = vpack.c.bf16 %v1018_v61, %v840_v39  ;;  %v1267_v6 = vmul.f32 %v1018_v61, %v1018_v61  ;;  %v1186_v15 = vsel %vm1126_vm6, %v1018_v61, 0.0 }
 0x1a8   : > { %v1119_v54 = vadd.f32 %v1118_v46, %v842_v62  ;;  %v1268_v30 = vmul.f32 %v842_v62, %v842_v62  ;;  %v1187_v25 = vadd.f32 %v1186_v15, %v1185_v17 }
 0x1a9   : > { %1087 = vst.msk [vmem:[%s2166_s22 + $0xf0] sm:$0xff] %vm2168_vm5, %v1052_v60  ;;  %v1366_v22 = vsel %vm1126_vm6, %v1267_v6, 0.0 }
 0x1aa   : > { %v1120_v9 = vrot.slane %v1119_v54, 4  ;;  %v1300_v13 = vadd.f32 %v1299_v32, %v1268_v30  ;;  %v930_v14 = vpop.f32.mrf.mxu2  ;;  %v1367_v34 = vadd.f32 %v1366_v22, %v1365_v24 }
 0x1ab   : > { %v931_v0 = vadd.f32 %v930_v14, %v2155_v2 }
 0x1ac   : > { %v1301_v21 = vrot.slane %v1300_v13, 4  ;;  %v1121_v1 = vadd.f32 %v1120_v9, %v1119_v54 }
 0x1ad   : > { %v1020_v23 = vadd.f32 %v1019_v18, %v931_v0 }
 0x1ae   : > { %v1302_v36 = vadd.f32 %v1301_v21, %v1300_v13  ;;  %v1122_v37 = vrot.slane %v1121_v1, 2 }
 0x1af   : > { %v1053_v10 = vpack.c.bf16 %v1020_v23, %v842_v62  ;;  %v1188_v26 = vsel %vm1126_vm6, %v1020_v23, 0.0  ;;  %v1269_v31 = vmul.f32 %v1020_v23, %v1020_v23 }
 0x1b0   : > { %v1189_v35 = vadd.f32 %v1188_v26, %v1187_v25  ;;  %v1303_v41 = vrot.slane %v1302_v36, 2  ;;  %v1123_v42 = vadd.f32 %v1122_v37, %v1121_v1 }
 0x1b1   : > { %1088 = vst.msk [vmem:[%s2166_s22 + $0xf8] sm:$0xff] %vm2168_vm5, %v1053_v10  ;;  %v1368_v2 = vsel %vm1126_vm6, %v1269_v31, 0.0 }
 0x1b2   : > { %v1190_v39 = vrot.slane %v1189_v35, 4  ;;  %v1369_v40 = vadd.f32 %v1368_v2, %v1367_v34  ;;  %v1304_v47 = vadd.f32 %v1303_v41, %v1302_v36  ;;  %v1124_v27 = vrot.slane %v1123_v42, 1 }
 0x1b4   : > { %v1191_v12 = vadd.f32 %v1190_v39, %v1189_v35  ;;  %v1370_v19 = vrot.slane %v1369_v40, 4  ;;  %v1305_v53 = vrot.slane %v1304_v47, 1  ;;  %v1125_v58 = vadd.f32 %v1124_v27, %v1123_v42 }
 0x1b6   : > { %v1192_v43 = vrot.slane %v1191_v12, 2  ;;  %v1371_v44 = vadd.f32 %v1370_v19, %v1369_v40  ;;  %v1306_v49 = vadd.f32 %v1305_v53, %v1304_v47 }
 0x1b8   : > { %v1193_v48 = vadd.f32 %v1192_v43, %v1191_v12  ;;  %v1372_v38 = vrot.slane %v1371_v44, 2 }
 0x1ba   : > { %v1194_v51 = vrot.slane %v1193_v48, 1  ;;  %v1373_v11 = vadd.f32 %v1372_v38, %v1371_v44 }
 0x1bc   : > { %v1195_v56 = vadd.f32 %v1194_v51, %v1193_v48  ;;  %v1374_v57 = vrot.slane %v1373_v11, 1 }
 0x1be   : > { %v1198_v20 = vrot.slane %v1195_v56, 7  ;;  %v1375_v59 = vadd.f32 %v1374_v57, %v1373_v11 }
 0x1c0   : > { %v1199_v28 = vsel %vm656_vm0, %v1125_v58, %v1198_v20  ;;  %v1378_v61 = vrot.slane %v1375_v59, 7 }
 0x1c1   : > { %1205 = vst.msk [vmem:[%s301_s25] sm:$0x3] %vm1203_vm7, %v1199_v28 }
 0x1c2   : > { %v1379_v29 = vsel %vm656_vm0, %v1306_v49, %v1378_v61 }
 0x1c3   : > { %1381 = vst.msk [vmem:[%s309_s28] sm:$0x3] %vm1203_vm7, %v1379_v29 }
 0x1c4 PF: > { %s16_s20 = sadd.s32 1, %s1916_s20   ;;  %s2553_s18 = smov %s1912_s19 }
 0x1c5   : > { %p13_p5 = scmp.ge.s32.totalorder %s16_s20, 4   ;;  %s2554_s19 = smov %s2556_s21 }
 0x1c7   :  { %15 = sbr.rel (!%p13_p5) target bundleno = 2 (0x2), region = 86 }

</bundles_post_ra>
